<compile_context>
chip_gen: v6e
topology: v6e:2x2x1
jax: 0.10.0
libtpu: 0.0.40
codegen_flags: <defaults>
</compile_context>

<pallas_src>
import math

import jax
import jax.numpy as jnp
from jax.experimental import pallas as pl
from jax.experimental.pallas import tpu as pltpu

# ----------------------------- configuration -------------------------------
B = 2            # batch
S = 8            # sequence length
H = 32           # hidden size
NUM_HEADS = 2
HEAD_DIM = H // NUM_HEADS
FFN = 64         # feed-forward inner size
VOCAB = 100
NUM_LAYERS = 2
NUM_LABELS = 2   # binary relevance head (softmax over dim=1, take [:, 1])
TOKENS = B * S
LANES = 128

MASK_NEG = -1e9          # additive attention bias for masked keys
PAD_NEG = -1e30          # bias on padded classifier lanes (exp -> exactly 0)
ATTN_SCALE = 1.0 / math.sqrt(HEAD_DIM)

# ---------------- W slab layout: (W_ROWS, 128) bf16 matmul weights ----------
LAYER_W_ROWS = 3 * H + FFN            # wqkv(H rows) + wo(H) + w1(H) + w2(FFN) = 160
WQKV_OFF, WO_OFF, W1_OFF, W2_OFF = 0, H, 2 * H, 3 * H
WP_ROW = NUM_LAYERS * LAYER_W_ROWS    # 320  (pooler)
WC_ROW = WP_ROW + H                   # 352  (classifier, lane-padded to 128)
W_ROWS = WC_ROW + H                   # 384  (multiple of 16 -> bf16 tile aligned)

# ---------------- P slab layout: (P_ROWS, 128) f32 biases / LN / pos-emb ----
POS_ROW = 0                           # rows [0, S): positional embeddings
EMB_LN_G_ROW = S
EMB_LN_B_ROW = S + 1
P_LAYER_BASE = S + 2                  # per layer: bqkv, bo, ln1_g, ln1_b, b1, b2, ln2_g, ln2_b
LAYER_P_ROWS = 8
BP_ROW = P_LAYER_BASE + NUM_LAYERS * LAYER_P_ROWS   # 26 (pooler bias)
BC_ROW = BP_ROW + 1                                  # 27 (classifier bias, lanes>=2 = PAD_NEG)
P_ROWS = 32                                          # padded to a sublane multiple


# --------------------------- in-kernel helpers ------------------------------
def _layer_norm(x, g, b):
    # x: (N, H) f32; g/b: (1, H) f32. f32 statistics (v5e-safe).
    mean = jnp.mean(x, axis=-1, keepdims=True)
    var = jnp.mean((x - mean) ** 2, axis=-1, keepdims=True)
    return (x - mean) * jax.lax.rsqrt(var + 1e-12) * g + b


def _gelu(x):
    # TODO(synk): HF BERT default is erf-GELU; tanh-approx used here (EUP tanh).
    return 0.5 * x * (1.0 + jnp.tanh(0.7978845608028654 * (x + 0.044715 * x * x * x)))


def _dot(a_bf16, w_bf16):
    # bf16 MXU operands, f32 accumulation.
    return jnp.dot(a_bf16, w_bf16, preferred_element_type=jnp.float32)


# ------------------------------- fused kernel -------------------------------
def _fused_kernel(ids_ref, mask_ref, wemb_ref, w_ref, p_ref, out_ref):
    f32, bf16 = jnp.float32, jnp.bfloat16

    def prow(r, n):               # one P-slab row, first n lanes -> (1, n) f32
        return p_ref[r:r + 1, 0:n]

    # ---- in-kernel embedding gather + positional add + embedding LayerNorm ----
    rows = [wemb_ref[pl.ds(ids_ref[t], 1), :] for t in range(TOKENS)]    # 16 x (1, H)
    emb = jnp.concatenate(rows, axis=0)                                  # (B*S, H) f32
    pos = p_ref[POS_ROW:POS_ROW + S, 0:H]                                # (S, H)
    pos = jnp.concatenate([pos] * B, axis=0)                             # (B*S, H)
    x = _layer_norm(emb + pos, prow(EMB_LN_G_ROW, H), prow(EMB_LN_B_ROW, H))

    # ---- additive attention bias built in-kernel from the raw int mask ----
    # NOTE: an all-zero mask row degenerates to uniform attention over padding.
    maskf = mask_ref[...].astype(f32)                                    # (B, S)
    attn_bias = ((1.0 - maskf) * MASK_NEG).reshape(B, 1, S)              # broadcast over queries

    for l in range(NUM_LAYERS):                                          # static unroll
        wbase = l * LAYER_W_ROWS
        pbase = P_LAYER_BASE + l * LAYER_P_ROWS

        # -------- self attention: fused QKV, batch-flattened dense matmul --------
        wqkv = w_ref[wbase + WQKV_OFF: wbase + WQKV_OFF + H, 0:3 * H]    # (H, 3H) bf16
        qkv = _dot(x.astype(bf16), wqkv) + prow(pbase + 0, 3 * H)        # (B*S, 3H) f32
        qkv_b = qkv.astype(bf16).reshape(B, S, 3 * H)                    # cast once, slice bf16 heads

        ctx_heads = []
        for h in range(NUM_HEADS):                                       # static unroll
            lo = h * HEAD_DIM
            qh = qkv_b[:, :, lo:lo + HEAD_DIM]                           # (B, S, Dh)
            kh = qkv_b[:, :, H + lo:H + lo + HEAD_DIM]
            vh = qkv_b[:, :, 2 * H + lo:2 * H + lo + HEAD_DIM]
            s = jnp.einsum("bqd,bkd->bqk", qh, kh,
                           preferred_element_type=f32)                   # (B, S, S), no transpose
            s = s * ATTN_SCALE + attn_bias
            s = s - jnp.max(s, axis=-1, keepdims=True)
            e = jnp.exp(s)
            p_attn = e / jnp.sum(e, axis=-1, keepdims=True)              # exact softmax
            ctx_heads.append(jnp.einsum("bqk,bkd->bqd", p_attn.astype(bf16), vh,
                                        preferred_element_type=f32))     # (B, S, Dh)
        ctx = jnp.concatenate(ctx_heads, axis=-1).reshape(TOKENS, H)     # (B*S, H)

        wo = w_ref[wbase + WO_OFF: wbase + WO_OFF + H, 0:H]
        attn_out = _dot(ctx.astype(bf16), wo) + prow(pbase + 1, H)
        x = _layer_norm(x + attn_out, prow(pbase + 2, H), prow(pbase + 3, H))

        # --------------------------- feed forward ---------------------------
        w1 = w_ref[wbase + W1_OFF: wbase + W1_OFF + H, 0:FFN]
        w2 = w_ref[wbase + W2_OFF: wbase + W2_OFF + FFN, 0:H]
        ff = _gelu(_dot(x.astype(bf16), w1) + prow(pbase + 4, FFN))      # (B*S, FFN)
        ff = _dot(ff.astype(bf16), w2) + prow(pbase + 5, H)              # (B*S, H)
        x = _layer_norm(x + ff, prow(pbase + 6, H), prow(pbase + 7, H))

    # ---- CLS pooling + tanh pooler + classifier + exact softmax(dim=1) ----
    cls = jnp.concatenate([x[b * S:b * S + 1, :] for b in range(B)], axis=0)   # (B, H)
    wp = w_ref[WP_ROW:WP_ROW + H, 0:H]
    pooled = jnp.tanh(_dot(cls.astype(bf16), wp) + prow(BP_ROW, H))            # (B, H)

    wc = w_ref[WC_ROW:WC_ROW + H, 0:LANES]                                     # (H, 128), lanes>=2 are 0
    logits = _dot(pooled.astype(bf16), wc) + p_ref[BC_ROW:BC_ROW + 1, :]       # (B, 128); padded lanes -1e30
    logits = logits - jnp.max(logits, axis=-1, keepdims=True)
    e = jnp.exp(logits)                                   # padded lanes underflow to exactly 0
    out_ref[...] = e / jnp.sum(e, axis=-1, keepdims=True)  # lane-dense (B, 128) single store


# ------------------------------ host wrapper ---------------------------------
def fused_forward(ids_flat, mask, params):
    """ids_flat: (B*S,) int32; mask: (B, S) int32 -> softmax probs (B, NUM_LABELS)."""
    smem = pl.BlockSpec(memory_space=pltpu.MemorySpace.SMEM)
    vmem = pl.BlockSpec(memory_space=pltpu.MemorySpace.VMEM)

    out = pl.pallas_call(
        _fused_kernel,
        out_shape=jax.ShapeDtypeStruct((B, LANES), jnp.float32),
        in_specs=[smem, vmem, vmem, vmem, vmem],
        out_specs=vmem,
        compiler_params=pltpu.CompilerParams(vmem_limit_bytes=4 * 1024 * 1024),
        cost_estimate=pl.CostEstimate(flops=600_000, transcendentals=4_000,
                                      bytes_accessed=130_000),
    )(ids_flat, mask, params["word_emb"], params["w_slab"], params["p_slab"])
    return out[:, :NUM_LABELS]


# ------------------------------ parameters ----------------------------------
def init_params(key):
    # TODO(synk): AutoModelForSequenceClassification.from_pretrained loads a HF
    # checkpoint; here the same-architecture weights are randomly initialized.
    keys = iter(jax.random.split(key, 64))

    def w(shape, scale=0.02):
        return scale * jax.random.normal(next(keys), shape, dtype=jnp.float32)

    word_emb = w((VOCAB, H))
    pos_emb = w((S, H))

    w_slab = jnp.zeros((W_ROWS, LANES), jnp.float32)
    p_slab = jnp.zeros((P_ROWS, LANES), jnp.float32)

    # ---- P slab: pos-emb + LayerNorm params + biases (biases = 0, gamma = 1) ----
    p_slab = p_slab.at[POS_ROW:POS_ROW + S, 0:H].set(pos_emb)
    p_slab = p_slab.at[EMB_LN_G_ROW, 0:H].set(1.0)

    # ---- W slab: all matmul weights, lane-aligned (128-col rows), bf16 ----
    for l in range(NUM_LAYERS):
        wbase = l * LAYER_W_ROWS
        pbase = P_LAYER_BASE + l * LAYER_P_ROWS
        w_slab = w_slab.at[wbase + WQKV_OFF: wbase + WQKV_OFF + H, 0:3 * H].set(w((H, 3 * H)))
        w_slab = w_slab.at[wbase + WO_OFF: wbase + WO_OFF + H, 0:H].set(w((H, H)))
        w_slab = w_slab.at[wbase + W1_OFF: wbase + W1_OFF + H, 0:FFN].set(w((H, FFN)))
        w_slab = w_slab.at[wbase + W2_OFF: wbase + W2_OFF + FFN, 0:H].set(w((FFN, H)))
        p_slab = p_slab.at[pbase + 2, 0:H].set(1.0)   # ln1 gamma
        p_slab = p_slab.at[pbase + 6, 0:H].set(1.0)   # ln2 gamma

    w_slab = w_slab.at[WP_ROW:WP_ROW + H, 0:H].set(w((H, H)))                       # pooler
    w_slab = w_slab.at[WC_ROW:WC_ROW + H, 0:NUM_LABELS].set(w((H, NUM_LABELS)))     # classifier
    # Padded classifier lanes get a huge negative bias so the 128-lane softmax
    # is exactly the 2-label softmax (exp underflows to 0 on padded lanes).
    p_slab = p_slab.at[BC_ROW, NUM_LABELS:LANES].set(PAD_NEG)

    return {
        "word_emb": word_emb,                       # (VOCAB, H) f32, gathered in-kernel
        "w_slab": w_slab.astype(jnp.bfloat16),      # (384, 128) bf16
        "p_slab": p_slab,                           # (32, 128) f32
    }


# ------------------------------ forward pass ---------------------------------
def ms_marco_forward(params, query_doc_vectors, train=False):
    if train:
        # TODO(synk): the reference training branch returns None (no loss in the
        # original forward), so none is implemented.
        return None

    ids_flat = query_doc_vectors["input_ids"].astype(jnp.int32).reshape(TOKENS)   # (B*S,)
    mask = query_doc_vectors["attention_mask"].astype(jnp.int32).reshape(B, S)    # (B, S)

    # predictions = F.softmax(logits, dim=1); return predictions[:, 1]
    predictions = fused_forward(ids_flat, mask, params)                            # (B, NUM_LABELS)
    return predictions[:, 1]


# --------------------------------- main --------------------------------------
if __name__ == "__main__":
    key = jax.random.PRNGKey(0)
    pkey, dkey = jax.random.split(key)

    params = init_params(pkey)
    input_ids = jax.random.randint(dkey, (B, S), 0, VOCAB, dtype=jnp.int32)
    attention_mask = jnp.ones((B, S), dtype=jnp.int32).at[1, S - 1].set(0)  # one padded position
    query_doc_vectors = {"input_ids": input_ids, "attention_mask": attention_mask}

    out = ms_marco_forward(params, query_doc_vectors, train=False)
    out = jax.block_until_ready(out)

    assert out.shape == (B,), out.shape
    assert out.dtype == jnp.float32
    assert bool(jnp.all(jnp.isfinite(out)))
    assert bool(jnp.all((out >= 0.0) & (out <= 1.0)))   # softmax probabilities

    assert ms_marco_forward(params, query_doc_vectors, train=True) is None

    print("KERNEL_OK")
</pallas_src>

<mosaic_0001>
module attributes {stable_mosaic.version = 11 : i64} {
  func.func @_fused_kernel(%arg0: memref<16xi32, #tpu.memory_space<smem>>, %arg1: memref<2x8xi32, #tpu.memory_space<vmem>>, %arg2: memref<100x32xf32, #tpu.memory_space<vmem>>, %arg3: memref<384x128xbf16, #tpu.memory_space<vmem>>, %arg4: memref<32x128xf32, #tpu.memory_space<vmem>>, %arg5: memref<2x128xf32, #tpu.memory_space<vmem>>) attributes {dimension_semantics = [], scalar_prefetch = 0 : i64, scratch_operands = 0 : i64, tpu.core_type = #tpu.core_type<tc>} {
    %c0 = arith.constant 0 : index
    %0 = memref.load %arg0[%c0] : memref<16xi32, #tpu.memory_space<smem>>
    %1 = arith.index_cast %0 : i32 to index
    %c0_0 = arith.constant 0 : index
    %2 = vector.load %arg2[%1, %c0_0] : memref<100x32xf32, #tpu.memory_space<vmem>>, vector<1x32xf32>
    %c1 = arith.constant 1 : index
    %3 = memref.load %arg0[%c1] : memref<16xi32, #tpu.memory_space<smem>>
    %4 = arith.index_cast %3 : i32 to index
    %c0_1 = arith.constant 0 : index
    %5 = vector.load %arg2[%4, %c0_1] : memref<100x32xf32, #tpu.memory_space<vmem>>, vector<1x32xf32>
    %c2 = arith.constant 2 : index
    %6 = memref.load %arg0[%c2] : memref<16xi32, #tpu.memory_space<smem>>
    %7 = arith.index_cast %6 : i32 to index
    %c0_2 = arith.constant 0 : index
    %8 = vector.load %arg2[%7, %c0_2] : memref<100x32xf32, #tpu.memory_space<vmem>>, vector<1x32xf32>
    %c3 = arith.constant 3 : index
    %9 = memref.load %arg0[%c3] : memref<16xi32, #tpu.memory_space<smem>>
    %10 = arith.index_cast %9 : i32 to index
    %c0_3 = arith.constant 0 : index
    %11 = vector.load %arg2[%10, %c0_3] : memref<100x32xf32, #tpu.memory_space<vmem>>, vector<1x32xf32>
    %c4 = arith.constant 4 : index
    %12 = memref.load %arg0[%c4] : memref<16xi32, #tpu.memory_space<smem>>
    %13 = arith.index_cast %12 : i32 to index
    %c0_4 = arith.constant 0 : index
    %14 = vector.load %arg2[%13, %c0_4] : memref<100x32xf32, #tpu.memory_space<vmem>>, vector<1x32xf32>
    %c5 = arith.constant 5 : index
    %15 = memref.load %arg0[%c5] : memref<16xi32, #tpu.memory_space<smem>>
    %16 = arith.index_cast %15 : i32 to index
    %c0_5 = arith.constant 0 : index
    %17 = vector.load %arg2[%16, %c0_5] : memref<100x32xf32, #tpu.memory_space<vmem>>, vector<1x32xf32>
    %c6 = arith.constant 6 : index
    %18 = memref.load %arg0[%c6] : memref<16xi32, #tpu.memory_space<smem>>
    %19 = arith.index_cast %18 : i32 to index
    %c0_6 = arith.constant 0 : index
    %20 = vector.load %arg2[%19, %c0_6] : memref<100x32xf32, #tpu.memory_space<vmem>>, vector<1x32xf32>
    %c7 = arith.constant 7 : index
    %21 = memref.load %arg0[%c7] : memref<16xi32, #tpu.memory_space<smem>>
    %22 = arith.index_cast %21 : i32 to index
    %c0_7 = arith.constant 0 : index
    %23 = vector.load %arg2[%22, %c0_7] : memref<100x32xf32, #tpu.memory_space<vmem>>, vector<1x32xf32>
    %c8 = arith.constant 8 : index
    %24 = memref.load %arg0[%c8] : memref<16xi32, #tpu.memory_space<smem>>
    %25 = arith.index_cast %24 : i32 to index
    %c0_8 = arith.constant 0 : index
    %26 = vector.load %arg2[%25, %c0_8] : memref<100x32xf32, #tpu.memory_space<vmem>>, vector<1x32xf32>
    %c9 = arith.constant 9 : index
    %27 = memref.load %arg0[%c9] : memref<16xi32, #tpu.memory_space<smem>>
    %28 = arith.index_cast %27 : i32 to index
    %c0_9 = arith.constant 0 : index
    %29 = vector.load %arg2[%28, %c0_9] : memref<100x32xf32, #tpu.memory_space<vmem>>, vector<1x32xf32>
    %c10 = arith.constant 10 : index
    %30 = memref.load %arg0[%c10] : memref<16xi32, #tpu.memory_space<smem>>
    %31 = arith.index_cast %30 : i32 to index
    %c0_10 = arith.constant 0 : index
    %32 = vector.load %arg2[%31, %c0_10] : memref<100x32xf32, #tpu.memory_space<vmem>>, vector<1x32xf32>
    %c11 = arith.constant 11 : index
    %33 = memref.load %arg0[%c11] : memref<16xi32, #tpu.memory_space<smem>>
    %34 = arith.index_cast %33 : i32 to index
    %c0_11 = arith.constant 0 : index
    %35 = vector.load %arg2[%34, %c0_11] : memref<100x32xf32, #tpu.memory_space<vmem>>, vector<1x32xf32>
    %c12 = arith.constant 12 : index
    %36 = memref.load %arg0[%c12] : memref<16xi32, #tpu.memory_space<smem>>
    %37 = arith.index_cast %36 : i32 to index
    %c0_12 = arith.constant 0 : index
    %38 = vector.load %arg2[%37, %c0_12] : memref<100x32xf32, #tpu.memory_space<vmem>>, vector<1x32xf32>
    %c13 = arith.constant 13 : index
    %39 = memref.load %arg0[%c13] : memref<16xi32, #tpu.memory_space<smem>>
    %40 = arith.index_cast %39 : i32 to index
    %c0_13 = arith.constant 0 : index
    %41 = vector.load %arg2[%40, %c0_13] : memref<100x32xf32, #tpu.memory_space<vmem>>, vector<1x32xf32>
    %c14 = arith.constant 14 : index
    %42 = memref.load %arg0[%c14] : memref<16xi32, #tpu.memory_space<smem>>
    %43 = arith.index_cast %42 : i32 to index
    %c0_14 = arith.constant 0 : index
    %44 = vector.load %arg2[%43, %c0_14] : memref<100x32xf32, #tpu.memory_space<vmem>>, vector<1x32xf32>
    %c15 = arith.constant 15 : index
    %45 = memref.load %arg0[%c15] : memref<16xi32, #tpu.memory_space<smem>>
    %46 = arith.index_cast %45 : i32 to index
    %c0_15 = arith.constant 0 : index
    %47 = vector.load %arg2[%46, %c0_15] : memref<100x32xf32, #tpu.memory_space<vmem>>, vector<1x32xf32>
    %48 = tpu.concatenate %2, %5, %8, %11, %14, %17, %20, %23, %26, %29, %32, %35, %38, %41, %44, %47 in 0 : vector<1x32xf32>, vector<1x32xf32>, vector<1x32xf32>, vector<1x32xf32>, vector<1x32xf32>, vector<1x32xf32>, vector<1x32xf32>, vector<1x32xf32>, vector<1x32xf32>, vector<1x32xf32>, vector<1x32xf32>, vector<1x32xf32>, vector<1x32xf32>, vector<1x32xf32>, vector<1x32xf32>, vector<1x32xf32> -> vector<16x32xf32>
    %c0_16 = arith.constant 0 : index
    %c0_17 = arith.constant 0 : index
    %49 = vector.load %arg4[%c0_16, %c0_17] : memref<32x128xf32, #tpu.memory_space<vmem>>, vector<8x32xf32>
    %50 = tpu.concatenate %49, %49 in 0 : vector<8x32xf32>, vector<8x32xf32> -> vector<16x32xf32>
    %51 = arith.addf %48, %50 : vector<16x32xf32>
    %c8_18 = arith.constant 8 : index
    %c0_19 = arith.constant 0 : index
    %52 = vector.load %arg4[%c8_18, %c0_19] : memref<32x128xf32, #tpu.memory_space<vmem>>, vector<1x32xf32>
    %c9_20 = arith.constant 9 : index
    %c0_21 = arith.constant 0 : index
    %53 = vector.load %arg4[%c9_20, %c0_21] : memref<32x128xf32, #tpu.memory_space<vmem>>, vector<1x32xf32>
    %cst = arith.constant dense<0.000000e+00> : vector<16xf32>
    %54 = vector.multi_reduction <add>, %51, %cst [1] : vector<16x32xf32> to vector<16xf32>
    %55 = vector.shape_cast %54 : vector<16xf32> to vector<16x1xf32>
    %cst_22 = arith.constant 3.200000e+01 : f32
    %56 = vector.broadcast %cst_22 : f32 to vector<16x1xf32>
    %57 = arith.divf %55, %56 : vector<16x1xf32>
    %58 = vector.broadcast %57 : vector<16x1xf32> to vector<16x32xf32>
    %59 = arith.subf %51, %58 : vector<16x32xf32>
    %60 = arith.mulf %59, %59 : vector<16x32xf32>
    %cst_23 = arith.constant dense<0.000000e+00> : vector<16xf32>
    %61 = vector.multi_reduction <add>, %60, %cst_23 [1] : vector<16x32xf32> to vector<16xf32>
    %62 = vector.shape_cast %61 : vector<16xf32> to vector<16x1xf32>
    %cst_24 = arith.constant 3.200000e+01 : f32
    %63 = vector.broadcast %cst_24 : f32 to vector<16x1xf32>
    %64 = arith.divf %62, %63 : vector<16x1xf32>
    %65 = vector.broadcast %57 : vector<16x1xf32> to vector<16x32xf32>
    %66 = arith.subf %51, %65 : vector<16x32xf32>
    %cst_25 = arith.constant 9.99999996E-13 : f32
    %67 = vector.broadcast %cst_25 : f32 to vector<16x1xf32>
    %68 = arith.addf %64, %67 : vector<16x1xf32>
    %69 = math.rsqrt %68 : vector<16x1xf32>
    %70 = vector.broadcast %69 : vector<16x1xf32> to vector<16x32xf32>
    %71 = arith.mulf %66, %70 : vector<16x32xf32>
    %72 = vector.broadcast %52 : vector<1x32xf32> to vector<16x32xf32>
    %73 = arith.mulf %71, %72 : vector<16x32xf32>
    %74 = vector.broadcast %53 : vector<1x32xf32> to vector<16x32xf32>
    %75 = arith.addf %73, %74 : vector<16x32xf32>
    %c0_26 = arith.constant 0 : index
    %c0_27 = arith.constant 0 : index
    %76 = vector.load %arg1[%c0_26, %c0_27] : memref<2x8xi32, #tpu.memory_space<vmem>>, vector<2x8xi32>
    %77 = arith.sitofp %76 : vector<2x8xi32> to vector<2x8xf32>
    %cst_28 = arith.constant 1.000000e+00 : f32
    %78 = vector.broadcast %cst_28 : f32 to vector<2x8xf32>
    %79 = arith.subf %78, %77 : vector<2x8xf32>
    %cst_29 = arith.constant -1.000000e+09 : f32
    %80 = vector.broadcast %cst_29 : f32 to vector<2x8xf32>
    %81 = arith.mulf %79, %80 : vector<2x8xf32>
    %82 = vector.shape_cast %81 : vector<2x8xf32> to vector<2x1x8xf32>
    %c0_30 = arith.constant 0 : index
    %c0_31 = arith.constant 0 : index
    %83 = vector.load %arg3[%c0_30, %c0_31] : memref<384x128xbf16, #tpu.memory_space<vmem>>, vector<32x96xbf16>
    %84 = arith.truncf %75 : vector<16x32xf32> to vector<16x32xbf16>
    %cst_32 = arith.constant dense<0.000000e+00> : vector<16x96xf32>
    %85 = tpu.matmul %84, %83, %cst_32 {dimension_numbers = #tpu.dot_dimension_numbers<[1], [0], [0], [1], [0, 0, 1, 1], [], []>} : vector<16x32xbf16>, vector<32x96xbf16>, vector<16x96xf32> -> vector<16x96xf32>
    %c10_33 = arith.constant 10 : index
    %c0_34 = arith.constant 0 : index
    %86 = vector.load %arg4[%c10_33, %c0_34] : memref<32x128xf32, #tpu.memory_space<vmem>>, vector<1x96xf32>
    %87 = vector.broadcast %86 : vector<1x96xf32> to vector<16x96xf32>
    %88 = arith.addf %85, %87 : vector<16x96xf32>
    %89 = arith.truncf %88 : vector<16x96xf32> to vector<16x96xbf16>
    %90 = vector.shape_cast %89 : vector<16x96xbf16> to vector<2x8x96xbf16>
    %91 = vector.extract_strided_slice %90 {offsets = [0, 0, 0], sizes = [2, 8, 16], strides = [1, 1, 1]} : vector<2x8x96xbf16> to vector<2x8x16xbf16>
    %92 = vector.extract_strided_slice %90 {offsets = [0, 0, 32], sizes = [2, 8, 16], strides = [1, 1, 1]} : vector<2x8x96xbf16> to vector<2x8x16xbf16>
    %93 = vector.extract_strided_slice %90 {offsets = [0, 0, 64], sizes = [2, 8, 16], strides = [1, 1, 1]} : vector<2x8x96xbf16> to vector<2x8x16xbf16>
    "tpu.trace_start"() <{level = 10 : i32, message = "bqd,bkd->bqk"}> : () -> ()
    %cst_35 = arith.constant dense<0.000000e+00> : vector<2x8x8xf32>
    %94 = tpu.matmul %91, %92, %cst_35 {dimension_numbers = #tpu.dot_dimension_numbers<[2], [2], [1], [1], [0, 0, 0, 1, 1, 1], [0], [0]>} : vector<2x8x16xbf16>, vector<2x8x16xbf16>, vector<2x8x8xf32> -> vector<2x8x8xf32>
    "tpu.trace_stop"() : () -> ()
    %cst_36 = arith.constant 2.500000e-01 : f32
    %95 = vector.broadcast %cst_36 : f32 to vector<2x8x8xf32>
    %96 = arith.mulf %94, %95 : vector<2x8x8xf32>
    %97 = vector.broadcast %82 : vector<2x1x8xf32> to vector<2x8x8xf32>
    %98 = arith.addf %96, %97 : vector<2x8x8xf32>
    %cst_37 = arith.constant dense<0xFF800000> : vector<2x8xf32>
    %99 = vector.multi_reduction <maximumf>, %98, %cst_37 [2] : vector<2x8x8xf32> to vector<2x8xf32>
    %100 = vector.shape_cast %99 : vector<2x8xf32> to vector<2x8x1xf32>
    %101 = vector.broadcast %100 : vector<2x8x1xf32> to vector<2x8x8xf32>
    %102 = arith.subf %98, %101 : vector<2x8x8xf32>
    %103 = math.exp %102 : vector<2x8x8xf32>
    %cst_38 = arith.constant dense<0.000000e+00> : vector<2x8xf32>
    %104 = vector.multi_reduction <add>, %103, %cst_38 [2] : vector<2x8x8xf32> to vector<2x8xf32>
    %105 = vector.shape_cast %104 : vector<2x8xf32> to vector<2x8x1xf32>
    %106 = vector.broadcast %105 : vector<2x8x1xf32> to vector<2x8x8xf32>
    %107 = arith.divf %103, %106 : vector<2x8x8xf32>
    %108 = arith.truncf %107 : vector<2x8x8xf32> to vector<2x8x8xbf16>
    "tpu.trace_start"() <{level = 10 : i32, message = "bqk,bkd->bqd"}> : () -> ()
    %cst_39 = arith.constant dense<0.000000e+00> : vector<2x8x16xf32>
    %109 = tpu.matmul %108, %93, %cst_39 {dimension_numbers = #tpu.dot_dimension_numbers<[2], [1], [1], [2], [0, 0, 0, 1, 1, 2], [0], [0]>} : vector<2x8x8xbf16>, vector<2x8x16xbf16>, vector<2x8x16xf32> -> vector<2x8x16xf32>
    "tpu.trace_stop"() : () -> ()
    %110 = vector.extract_strided_slice %90 {offsets = [0, 0, 16], sizes = [2, 8, 16], strides = [1, 1, 1]} : vector<2x8x96xbf16> to vector<2x8x16xbf16>
    %111 = vector.extract_strided_slice %90 {offsets = [0, 0, 48], sizes = [2, 8, 16], strides = [1, 1, 1]} : vector<2x8x96xbf16> to vector<2x8x16xbf16>
    %112 = vector.extract_strided_slice %90 {offsets = [0, 0, 80], sizes = [2, 8, 16], strides = [1, 1, 1]} : vector<2x8x96xbf16> to vector<2x8x16xbf16>
    "tpu.trace_start"() <{level = 10 : i32, message = "bqd,bkd->bqk"}> : () -> ()
    %cst_40 = arith.constant dense<0.000000e+00> : vector<2x8x8xf32>
    %113 = tpu.matmul %110, %111, %cst_40 {dimension_numbers = #tpu.dot_dimension_numbers<[2], [2], [1], [1], [0, 0, 0, 1, 1, 1], [0], [0]>} : vector<2x8x16xbf16>, vector<2x8x16xbf16>, vector<2x8x8xf32> -> vector<2x8x8xf32>
    "tpu.trace_stop"() : () -> ()
    %cst_41 = arith.constant 2.500000e-01 : f32
    %114 = vector.broadcast %cst_41 : f32 to vector<2x8x8xf32>
    %115 = arith.mulf %113, %114 : vector<2x8x8xf32>
    %116 = vector.broadcast %82 : vector<2x1x8xf32> to vector<2x8x8xf32>
    %117 = arith.addf %115, %116 : vector<2x8x8xf32>
    %cst_42 = arith.constant dense<0xFF800000> : vector<2x8xf32>
    %118 = vector.multi_reduction <maximumf>, %117, %cst_42 [2] : vector<2x8x8xf32> to vector<2x8xf32>
    %119 = vector.shape_cast %118 : vector<2x8xf32> to vector<2x8x1xf32>
    %120 = vector.broadcast %119 : vector<2x8x1xf32> to vector<2x8x8xf32>
    %121 = arith.subf %117, %120 : vector<2x8x8xf32>
    %122 = math.exp %121 : vector<2x8x8xf32>
    %cst_43 = arith.constant dense<0.000000e+00> : vector<2x8xf32>
    %123 = vector.multi_reduction <add>, %122, %cst_43 [2] : vector<2x8x8xf32> to vector<2x8xf32>
    %124 = vector.shape_cast %123 : vector<2x8xf32> to vector<2x8x1xf32>
    %125 = vector.broadcast %124 : vector<2x8x1xf32> to vector<2x8x8xf32>
    %126 = arith.divf %122, %125 : vector<2x8x8xf32>
    %127 = arith.truncf %126 : vector<2x8x8xf32> to vector<2x8x8xbf16>
    "tpu.trace_start"() <{level = 10 : i32, message = "bqk,bkd->bqd"}> : () -> ()
    %cst_44 = arith.constant dense<0.000000e+00> : vector<2x8x16xf32>
    %128 = tpu.matmul %127, %112, %cst_44 {dimension_numbers = #tpu.dot_dimension_numbers<[2], [1], [1], [2], [0, 0, 0, 1, 1, 2], [0], [0]>} : vector<2x8x8xbf16>, vector<2x8x16xbf16>, vector<2x8x16xf32> -> vector<2x8x16xf32>
    "tpu.trace_stop"() : () -> ()
    %129 = tpu.concatenate %109, %128 in 2 : vector<2x8x16xf32>, vector<2x8x16xf32> -> vector<2x8x32xf32>
    %130 = vector.shape_cast %129 : vector<2x8x32xf32> to vector<16x32xf32>
    %c32 = arith.constant 32 : index
    %c0_45 = arith.constant 0 : index
    %131 = vector.load %arg3[%c32, %c0_45] : memref<384x128xbf16, #tpu.memory_space<vmem>>, vector<32x32xbf16>
    %132 = arith.truncf %130 : vector<16x32xf32> to vector<16x32xbf16>
    %cst_46 = arith.constant dense<0.000000e+00> : vector<16x32xf32>
    %133 = tpu.matmul %132, %131, %cst_46 {dimension_numbers = #tpu.dot_dimension_numbers<[1], [0], [0], [1], [0, 0, 1, 1], [], []>} : vector<16x32xbf16>, vector<32x32xbf16>, vector<16x32xf32> -> vector<16x32xf32>
    %c11_47 = arith.constant 11 : index
    %c0_48 = arith.constant 0 : index
    %134 = vector.load %arg4[%c11_47, %c0_48] : memref<32x128xf32, #tpu.memory_space<vmem>>, vector<1x32xf32>
    %135 = vector.broadcast %134 : vector<1x32xf32> to vector<16x32xf32>
    %136 = arith.addf %133, %135 : vector<16x32xf32>
    %137 = arith.addf %75, %136 : vector<16x32xf32>
    %c12_49 = arith.constant 12 : index
    %c0_50 = arith.constant 0 : index
    %138 = vector.load %arg4[%c12_49, %c0_50] : memref<32x128xf32, #tpu.memory_space<vmem>>, vector<1x32xf32>
    %c13_51 = arith.constant 13 : index
    %c0_52 = arith.constant 0 : index
    %139 = vector.load %arg4[%c13_51, %c0_52] : memref<32x128xf32, #tpu.memory_space<vmem>>, vector<1x32xf32>
    %cst_53 = arith.constant dense<0.000000e+00> : vector<16xf32>
    %140 = vector.multi_reduction <add>, %137, %cst_53 [1] : vector<16x32xf32> to vector<16xf32>
    %141 = vector.shape_cast %140 : vector<16xf32> to vector<16x1xf32>
    %cst_54 = arith.constant 3.200000e+01 : f32
    %142 = vector.broadcast %cst_54 : f32 to vector<16x1xf32>
    %143 = arith.divf %141, %142 : vector<16x1xf32>
    %144 = vector.broadcast %143 : vector<16x1xf32> to vector<16x32xf32>
    %145 = arith.subf %137, %144 : vector<16x32xf32>
    %146 = arith.mulf %145, %145 : vector<16x32xf32>
    %cst_55 = arith.constant dense<0.000000e+00> : vector<16xf32>
    %147 = vector.multi_reduction <add>, %146, %cst_55 [1] : vector<16x32xf32> to vector<16xf32>
    %148 = vector.shape_cast %147 : vector<16xf32> to vector<16x1xf32>
    %cst_56 = arith.constant 3.200000e+01 : f32
    %149 = vector.broadcast %cst_56 : f32 to vector<16x1xf32>
    %150 = arith.divf %148, %149 : vector<16x1xf32>
    %151 = vector.broadcast %143 : vector<16x1xf32> to vector<16x32xf32>
    %152 = arith.subf %137, %151 : vector<16x32xf32>
    %cst_57 = arith.constant 9.99999996E-13 : f32
    %153 = vector.broadcast %cst_57 : f32 to vector<16x1xf32>
    %154 = arith.addf %150, %153 : vector<16x1xf32>
    %155 = math.rsqrt %154 : vector<16x1xf32>
    %156 = vector.broadcast %155 : vector<16x1xf32> to vector<16x32xf32>
    %157 = arith.mulf %152, %156 : vector<16x32xf32>
    %158 = vector.broadcast %138 : vector<1x32xf32> to vector<16x32xf32>
    %159 = arith.mulf %157, %158 : vector<16x32xf32>
    %160 = vector.broadcast %139 : vector<1x32xf32> to vector<16x32xf32>
    %161 = arith.addf %159, %160 : vector<16x32xf32>
    %c64 = arith.constant 64 : index
    %c0_58 = arith.constant 0 : index
    %162 = vector.load %arg3[%c64, %c0_58] : memref<384x128xbf16, #tpu.memory_space<vmem>>, vector<32x64xbf16>
    %c96 = arith.constant 96 : index
    %c0_59 = arith.constant 0 : index
    %163 = vector.load %arg3[%c96, %c0_59] : memref<384x128xbf16, #tpu.memory_space<vmem>>, vector<64x32xbf16>
    %164 = arith.truncf %161 : vector<16x32xf32> to vector<16x32xbf16>
    %cst_60 = arith.constant dense<0.000000e+00> : vector<16x64xf32>
    %165 = tpu.matmul %164, %162, %cst_60 {dimension_numbers = #tpu.dot_dimension_numbers<[1], [0], [0], [1], [0, 0, 1, 1], [], []>} : vector<16x32xbf16>, vector<32x64xbf16>, vector<16x64xf32> -> vector<16x64xf32>
    %c14_61 = arith.constant 14 : index
    %c0_62 = arith.constant 0 : index
    %166 = vector.load %arg4[%c14_61, %c0_62] : memref<32x128xf32, #tpu.memory_space<vmem>>, vector<1x64xf32>
    %167 = vector.broadcast %166 : vector<1x64xf32> to vector<16x64xf32>
    %168 = arith.addf %165, %167 : vector<16x64xf32>
    %cst_63 = arith.constant 5.000000e-01 : f32
    %169 = vector.broadcast %cst_63 : f32 to vector<16x64xf32>
    %170 = arith.mulf %169, %168 : vector<16x64xf32>
    %cst_64 = arith.constant 4.471500e-02 : f32
    %171 = vector.broadcast %cst_64 : f32 to vector<16x64xf32>
    %172 = arith.mulf %171, %168 : vector<16x64xf32>
    %173 = arith.mulf %172, %168 : vector<16x64xf32>
    %174 = arith.mulf %173, %168 : vector<16x64xf32>
    %175 = arith.addf %168, %174 : vector<16x64xf32>
    %cst_65 = arith.constant 0.797884583 : f32
    %176 = vector.broadcast %cst_65 : f32 to vector<16x64xf32>
    %177 = arith.mulf %176, %175 : vector<16x64xf32>
    %178 = math.tanh %177 : vector<16x64xf32>
    %cst_66 = arith.constant 1.000000e+00 : f32
    %179 = vector.broadcast %cst_66 : f32 to vector<16x64xf32>
    %180 = arith.addf %179, %178 : vector<16x64xf32>
    %181 = arith.mulf %170, %180 : vector<16x64xf32>
    %182 = arith.truncf %181 : vector<16x64xf32> to vector<16x64xbf16>
    %cst_67 = arith.constant dense<0.000000e+00> : vector<16x32xf32>
    %183 = tpu.matmul %182, %163, %cst_67 {dimension_numbers = #tpu.dot_dimension_numbers<[1], [0], [0], [1], [0, 0, 1, 1], [], []>} : vector<16x64xbf16>, vector<64x32xbf16>, vector<16x32xf32> -> vector<16x32xf32>
    %c15_68 = arith.constant 15 : index
    %c0_69 = arith.constant 0 : index
    %184 = vector.load %arg4[%c15_68, %c0_69] : memref<32x128xf32, #tpu.memory_space<vmem>>, vector<1x32xf32>
    %185 = vector.broadcast %184 : vector<1x32xf32> to vector<16x32xf32>
    %186 = arith.addf %183, %185 : vector<16x32xf32>
    %187 = arith.addf %161, %186 : vector<16x32xf32>
    %c16 = arith.constant 16 : index
    %c0_70 = arith.constant 0 : index
    %188 = vector.load %arg4[%c16, %c0_70] : memref<32x128xf32, #tpu.memory_space<vmem>>, vector<1x32xf32>
    %c17 = arith.constant 17 : index
    %c0_71 = arith.constant 0 : index
    %189 = vector.load %arg4[%c17, %c0_71] : memref<32x128xf32, #tpu.memory_space<vmem>>, vector<1x32xf32>
    %cst_72 = arith.constant dense<0.000000e+00> : vector<16xf32>
    %190 = vector.multi_reduction <add>, %187, %cst_72 [1] : vector<16x32xf32> to vector<16xf32>
    %191 = vector.shape_cast %190 : vector<16xf32> to vector<16x1xf32>
    %cst_73 = arith.constant 3.200000e+01 : f32
    %192 = vector.broadcast %cst_73 : f32 to vector<16x1xf32>
    %193 = arith.divf %191, %192 : vector<16x1xf32>
    %194 = vector.broadcast %193 : vector<16x1xf32> to vector<16x32xf32>
    %195 = arith.subf %187, %194 : vector<16x32xf32>
    %196 = arith.mulf %195, %195 : vector<16x32xf32>
    %cst_74 = arith.constant dense<0.000000e+00> : vector<16xf32>
    %197 = vector.multi_reduction <add>, %196, %cst_74 [1] : vector<16x32xf32> to vector<16xf32>
    %198 = vector.shape_cast %197 : vector<16xf32> to vector<16x1xf32>
    %cst_75 = arith.constant 3.200000e+01 : f32
    %199 = vector.broadcast %cst_75 : f32 to vector<16x1xf32>
    %200 = arith.divf %198, %199 : vector<16x1xf32>
    %201 = vector.broadcast %193 : vector<16x1xf32> to vector<16x32xf32>
    %202 = arith.subf %187, %201 : vector<16x32xf32>
    %cst_76 = arith.constant 9.99999996E-13 : f32
    %203 = vector.broadcast %cst_76 : f32 to vector<16x1xf32>
    %204 = arith.addf %200, %203 : vector<16x1xf32>
    %205 = math.rsqrt %204 : vector<16x1xf32>
    %206 = vector.broadcast %205 : vector<16x1xf32> to vector<16x32xf32>
    %207 = arith.mulf %202, %206 : vector<16x32xf32>
    %208 = vector.broadcast %188 : vector<1x32xf32> to vector<16x32xf32>
    %209 = arith.mulf %207, %208 : vector<16x32xf32>
    %210 = vector.broadcast %189 : vector<1x32xf32> to vector<16x32xf32>
    %211 = arith.addf %209, %210 : vector<16x32xf32>
    %c160 = arith.constant 160 : index
    %c0_77 = arith.constant 0 : index
    %212 = vector.load %arg3[%c160, %c0_77] : memref<384x128xbf16, #tpu.memory_space<vmem>>, vector<32x96xbf16>
    %213 = arith.truncf %211 : vector<16x32xf32> to vector<16x32xbf16>
    %cst_78 = arith.constant dense<0.000000e+00> : vector<16x96xf32>
    %214 = tpu.matmul %213, %212, %cst_78 {dimension_numbers = #tpu.dot_dimension_numbers<[1], [0], [0], [1], [0, 0, 1, 1], [], []>} : vector<16x32xbf16>, vector<32x96xbf16>, vector<16x96xf32> -> vector<16x96xf32>
    %c18 = arith.constant 18 : index
    %c0_79 = arith.constant 0 : index
    %215 = vector.load %arg4[%c18, %c0_79] : memref<32x128xf32, #tpu.memory_space<vmem>>, vector<1x96xf32>
    %216 = vector.broadcast %215 : vector<1x96xf32> to vector<16x96xf32>
    %217 = arith.addf %214, %216 : vector<16x96xf32>
    %218 = arith.truncf %217 : vector<16x96xf32> to vector<16x96xbf16>
    %219 = vector.shape_cast %218 : vector<16x96xbf16> to vector<2x8x96xbf16>
    %220 = vector.extract_strided_slice %219 {offsets = [0, 0, 0], sizes = [2, 8, 16], strides = [1, 1, 1]} : vector<2x8x96xbf16> to vector<2x8x16xbf16>
    %221 = vector.extract_strided_slice %219 {offsets = [0, 0, 32], sizes = [2, 8, 16], strides = [1, 1, 1]} : vector<2x8x96xbf16> to vector<2x8x16xbf16>
    %222 = vector.extract_strided_slice %219 {offsets = [0, 0, 64], sizes = [2, 8, 16], strides = [1, 1, 1]} : vector<2x8x96xbf16> to vector<2x8x16xbf16>
    "tpu.trace_start"() <{level = 10 : i32, message = "bqd,bkd->bqk"}> : () -> ()
    %cst_80 = arith.constant dense<0.000000e+00> : vector<2x8x8xf32>
    %223 = tpu.matmul %220, %221, %cst_80 {dimension_numbers = #tpu.dot_dimension_numbers<[2], [2], [1], [1], [0, 0, 0, 1, 1, 1], [0], [0]>} : vector<2x8x16xbf16>, vector<2x8x16xbf16>, vector<2x8x8xf32> -> vector<2x8x8xf32>
    "tpu.trace_stop"() : () -> ()
    %cst_81 = arith.constant 2.500000e-01 : f32
    %224 = vector.broadcast %cst_81 : f32 to vector<2x8x8xf32>
    %225 = arith.mulf %223, %224 : vector<2x8x8xf32>
    %226 = vector.broadcast %82 : vector<2x1x8xf32> to vector<2x8x8xf32>
    %227 = arith.addf %225, %226 : vector<2x8x8xf32>
    %cst_82 = arith.constant dense<0xFF800000> : vector<2x8xf32>
    %228 = vector.multi_reduction <maximumf>, %227, %cst_82 [2] : vector<2x8x8xf32> to vector<2x8xf32>
    %229 = vector.shape_cast %228 : vector<2x8xf32> to vector<2x8x1xf32>
    %230 = vector.broadcast %229 : vector<2x8x1xf32> to vector<2x8x8xf32>
    %231 = arith.subf %227, %230 : vector<2x8x8xf32>
    %232 = math.exp %231 : vector<2x8x8xf32>
    %cst_83 = arith.constant dense<0.000000e+00> : vector<2x8xf32>
    %233 = vector.multi_reduction <add>, %232, %cst_83 [2] : vector<2x8x8xf32> to vector<2x8xf32>
    %234 = vector.shape_cast %233 : vector<2x8xf32> to vector<2x8x1xf32>
    %235 = vector.broadcast %234 : vector<2x8x1xf32> to vector<2x8x8xf32>
    %236 = arith.divf %232, %235 : vector<2x8x8xf32>
    %237 = arith.truncf %236 : vector<2x8x8xf32> to vector<2x8x8xbf16>
    "tpu.trace_start"() <{level = 10 : i32, message = "bqk,bkd->bqd"}> : () -> ()
    %cst_84 = arith.constant dense<0.000000e+00> : vector<2x8x16xf32>
    %238 = tpu.matmul %237, %222, %cst_84 {dimension_numbers = #tpu.dot_dimension_numbers<[2], [1], [1], [2], [0, 0, 0, 1, 1, 2], [0], [0]>} : vector<2x8x8xbf16>, vector<2x8x16xbf16>, vector<2x8x16xf32> -> vector<2x8x16xf32>
    "tpu.trace_stop"() : () -> ()
    %239 = vector.extract_strided_slice %219 {offsets = [0, 0, 16], sizes = [2, 8, 16], strides = [1, 1, 1]} : vector<2x8x96xbf16> to vector<2x8x16xbf16>
    %240 = vector.extract_strided_slice %219 {offsets = [0, 0, 48], sizes = [2, 8, 16], strides = [1, 1, 1]} : vector<2x8x96xbf16> to vector<2x8x16xbf16>
    %241 = vector.extract_strided_slice %219 {offsets = [0, 0, 80], sizes = [2, 8, 16], strides = [1, 1, 1]} : vector<2x8x96xbf16> to vector<2x8x16xbf16>
    "tpu.trace_start"() <{level = 10 : i32, message = "bqd,bkd->bqk"}> : () -> ()
    %cst_85 = arith.constant dense<0.000000e+00> : vector<2x8x8xf32>
    %242 = tpu.matmul %239, %240, %cst_85 {dimension_numbers = #tpu.dot_dimension_numbers<[2], [2], [1], [1], [0, 0, 0, 1, 1, 1], [0], [0]>} : vector<2x8x16xbf16>, vector<2x8x16xbf16>, vector<2x8x8xf32> -> vector<2x8x8xf32>
    "tpu.trace_stop"() : () -> ()
    %cst_86 = arith.constant 2.500000e-01 : f32
    %243 = vector.broadcast %cst_86 : f32 to vector<2x8x8xf32>
    %244 = arith.mulf %242, %243 : vector<2x8x8xf32>
    %245 = vector.broadcast %82 : vector<2x1x8xf32> to vector<2x8x8xf32>
    %246 = arith.addf %244, %245 : vector<2x8x8xf32>
    %cst_87 = arith.constant dense<0xFF800000> : vector<2x8xf32>
    %247 = vector.multi_reduction <maximumf>, %246, %cst_87 [2] : vector<2x8x8xf32> to vector<2x8xf32>
    %248 = vector.shape_cast %247 : vector<2x8xf32> to vector<2x8x1xf32>
    %249 = vector.broadcast %248 : vector<2x8x1xf32> to vector<2x8x8xf32>
    %250 = arith.subf %246, %249 : vector<2x8x8xf32>
    %251 = math.exp %250 : vector<2x8x8xf32>
    %cst_88 = arith.constant dense<0.000000e+00> : vector<2x8xf32>
    %252 = vector.multi_reduction <add>, %251, %cst_88 [2] : vector<2x8x8xf32> to vector<2x8xf32>
    %253 = vector.shape_cast %252 : vector<2x8xf32> to vector<2x8x1xf32>
    %254 = vector.broadcast %253 : vector<2x8x1xf32> to vector<2x8x8xf32>
    %255 = arith.divf %251, %254 : vector<2x8x8xf32>
    %256 = arith.truncf %255 : vector<2x8x8xf32> to vector<2x8x8xbf16>
    "tpu.trace_start"() <{level = 10 : i32, message = "bqk,bkd->bqd"}> : () -> ()
    %cst_89 = arith.constant dense<0.000000e+00> : vector<2x8x16xf32>
    %257 = tpu.matmul %256, %241, %cst_89 {dimension_numbers = #tpu.dot_dimension_numbers<[2], [1], [1], [2], [0, 0, 0, 1, 1, 2], [0], [0]>} : vector<2x8x8xbf16>, vector<2x8x16xbf16>, vector<2x8x16xf32> -> vector<2x8x16xf32>
    "tpu.trace_stop"() : () -> ()
    %258 = tpu.concatenate %238, %257 in 2 : vector<2x8x16xf32>, vector<2x8x16xf32> -> vector<2x8x32xf32>
    %259 = vector.shape_cast %258 : vector<2x8x32xf32> to vector<16x32xf32>
    %c192 = arith.constant 192 : index
    %c0_90 = arith.constant 0 : index
    %260 = vector.load %arg3[%c192, %c0_90] : memref<384x128xbf16, #tpu.memory_space<vmem>>, vector<32x32xbf16>
    %261 = arith.truncf %259 : vector<16x32xf32> to vector<16x32xbf16>
    %cst_91 = arith.constant dense<0.000000e+00> : vector<16x32xf32>
    %262 = tpu.matmul %261, %260, %cst_91 {dimension_numbers = #tpu.dot_dimension_numbers<[1], [0], [0], [1], [0, 0, 1, 1], [], []>} : vector<16x32xbf16>, vector<32x32xbf16>, vector<16x32xf32> -> vector<16x32xf32>
    %c19 = arith.constant 19 : index
    %c0_92 = arith.constant 0 : index
    %263 = vector.load %arg4[%c19, %c0_92] : memref<32x128xf32, #tpu.memory_space<vmem>>, vector<1x32xf32>
    %264 = vector.broadcast %263 : vector<1x32xf32> to vector<16x32xf32>
    %265 = arith.addf %262, %264 : vector<16x32xf32>
    %266 = arith.addf %211, %265 : vector<16x32xf32>
    %c20 = arith.constant 20 : index
    %c0_93 = arith.constant 0 : index
    %267 = vector.load %arg4[%c20, %c0_93] : memref<32x128xf32, #tpu.memory_space<vmem>>, vector<1x32xf32>
    %c21 = arith.constant 21 : index
    %c0_94 = arith.constant 0 : index
    %268 = vector.load %arg4[%c21, %c0_94] : memref<32x128xf32, #tpu.memory_space<vmem>>, vector<1x32xf32>
    %cst_95 = arith.constant dense<0.000000e+00> : vector<16xf32>
    %269 = vector.multi_reduction <add>, %266, %cst_95 [1] : vector<16x32xf32> to vector<16xf32>
    %270 = vector.shape_cast %269 : vector<16xf32> to vector<16x1xf32>
    %cst_96 = arith.constant 3.200000e+01 : f32
    %271 = vector.broadcast %cst_96 : f32 to vector<16x1xf32>
    %272 = arith.divf %270, %271 : vector<16x1xf32>
    %273 = vector.broadcast %272 : vector<16x1xf32> to vector<16x32xf32>
    %274 = arith.subf %266, %273 : vector<16x32xf32>
    %275 = arith.mulf %274, %274 : vector<16x32xf32>
    %cst_97 = arith.constant dense<0.000000e+00> : vector<16xf32>
    %276 = vector.multi_reduction <add>, %275, %cst_97 [1] : vector<16x32xf32> to vector<16xf32>
    %277 = vector.shape_cast %276 : vector<16xf32> to vector<16x1xf32>
    %cst_98 = arith.constant 3.200000e+01 : f32
    %278 = vector.broadcast %cst_98 : f32 to vector<16x1xf32>
    %279 = arith.divf %277, %278 : vector<16x1xf32>
    %280 = vector.broadcast %272 : vector<16x1xf32> to vector<16x32xf32>
    %281 = arith.subf %266, %280 : vector<16x32xf32>
    %cst_99 = arith.constant 9.99999996E-13 : f32
    %282 = vector.broadcast %cst_99 : f32 to vector<16x1xf32>
    %283 = arith.addf %279, %282 : vector<16x1xf32>
    %284 = math.rsqrt %283 : vector<16x1xf32>
    %285 = vector.broadcast %284 : vector<16x1xf32> to vector<16x32xf32>
    %286 = arith.mulf %281, %285 : vector<16x32xf32>
    %287 = vector.broadcast %267 : vector<1x32xf32> to vector<16x32xf32>
    %288 = arith.mulf %286, %287 : vector<16x32xf32>
    %289 = vector.broadcast %268 : vector<1x32xf32> to vector<16x32xf32>
    %290 = arith.addf %288, %289 : vector<16x32xf32>
    %c224 = arith.constant 224 : index
    %c0_100 = arith.constant 0 : index
    %291 = vector.load %arg3[%c224, %c0_100] : memref<384x128xbf16, #tpu.memory_space<vmem>>, vector<32x64xbf16>
    %c256 = arith.constant 256 : index
    %c0_101 = arith.constant 0 : index
    %292 = vector.load %arg3[%c256, %c0_101] : memref<384x128xbf16, #tpu.memory_space<vmem>>, vector<64x32xbf16>
    %293 = arith.truncf %290 : vector<16x32xf32> to vector<16x32xbf16>
    %cst_102 = arith.constant dense<0.000000e+00> : vector<16x64xf32>
    %294 = tpu.matmul %293, %291, %cst_102 {dimension_numbers = #tpu.dot_dimension_numbers<[1], [0], [0], [1], [0, 0, 1, 1], [], []>} : vector<16x32xbf16>, vector<32x64xbf16>, vector<16x64xf32> -> vector<16x64xf32>
    %c22 = arith.constant 22 : index
    %c0_103 = arith.constant 0 : index
    %295 = vector.load %arg4[%c22, %c0_103] : memref<32x128xf32, #tpu.memory_space<vmem>>, vector<1x64xf32>
    %296 = vector.broadcast %295 : vector<1x64xf32> to vector<16x64xf32>
    %297 = arith.addf %294, %296 : vector<16x64xf32>
    %cst_104 = arith.constant 5.000000e-01 : f32
    %298 = vector.broadcast %cst_104 : f32 to vector<16x64xf32>
    %299 = arith.mulf %298, %297 : vector<16x64xf32>
    %cst_105 = arith.constant 4.471500e-02 : f32
    %300 = vector.broadcast %cst_105 : f32 to vector<16x64xf32>
    %301 = arith.mulf %300, %297 : vector<16x64xf32>
    %302 = arith.mulf %301, %297 : vector<16x64xf32>
    %303 = arith.mulf %302, %297 : vector<16x64xf32>
    %304 = arith.addf %297, %303 : vector<16x64xf32>
    %cst_106 = arith.constant 0.797884583 : f32
    %305 = vector.broadcast %cst_106 : f32 to vector<16x64xf32>
    %306 = arith.mulf %305, %304 : vector<16x64xf32>
    %307 = math.tanh %306 : vector<16x64xf32>
    %cst_107 = arith.constant 1.000000e+00 : f32
    %308 = vector.broadcast %cst_107 : f32 to vector<16x64xf32>
    %309 = arith.addf %308, %307 : vector<16x64xf32>
    %310 = arith.mulf %299, %309 : vector<16x64xf32>
    %311 = arith.truncf %310 : vector<16x64xf32> to vector<16x64xbf16>
    %cst_108 = arith.constant dense<0.000000e+00> : vector<16x32xf32>
    %312 = tpu.matmul %311, %292, %cst_108 {dimension_numbers = #tpu.dot_dimension_numbers<[1], [0], [0], [1], [0, 0, 1, 1], [], []>} : vector<16x64xbf16>, vector<64x32xbf16>, vector<16x32xf32> -> vector<16x32xf32>
    %c23 = arith.constant 23 : index
    %c0_109 = arith.constant 0 : index
    %313 = vector.load %arg4[%c23, %c0_109] : memref<32x128xf32, #tpu.memory_space<vmem>>, vector<1x32xf32>
    %314 = vector.broadcast %313 : vector<1x32xf32> to vector<16x32xf32>
    %315 = arith.addf %312, %314 : vector<16x32xf32>
    %316 = arith.addf %290, %315 : vector<16x32xf32>
    %c24 = arith.constant 24 : index
    %c0_110 = arith.constant 0 : index
    %317 = vector.load %arg4[%c24, %c0_110] : memref<32x128xf32, #tpu.memory_space<vmem>>, vector<1x32xf32>
    %c25 = arith.constant 25 : index
    %c0_111 = arith.constant 0 : index
    %318 = vector.load %arg4[%c25, %c0_111] : memref<32x128xf32, #tpu.memory_space<vmem>>, vector<1x32xf32>
    %cst_112 = arith.constant dense<0.000000e+00> : vector<16xf32>
    %319 = vector.multi_reduction <add>, %316, %cst_112 [1] : vector<16x32xf32> to vector<16xf32>
    %320 = vector.shape_cast %319 : vector<16xf32> to vector<16x1xf32>
    %cst_113 = arith.constant 3.200000e+01 : f32
    %321 = vector.broadcast %cst_113 : f32 to vector<16x1xf32>
    %322 = arith.divf %320, %321 : vector<16x1xf32>
    %323 = vector.broadcast %322 : vector<16x1xf32> to vector<16x32xf32>
    %324 = arith.subf %316, %323 : vector<16x32xf32>
    %325 = arith.mulf %324, %324 : vector<16x32xf32>
    %cst_114 = arith.constant dense<0.000000e+00> : vector<16xf32>
    %326 = vector.multi_reduction <add>, %325, %cst_114 [1] : vector<16x32xf32> to vector<16xf32>
    %327 = vector.shape_cast %326 : vector<16xf32> to vector<16x1xf32>
    %cst_115 = arith.constant 3.200000e+01 : f32
    %328 = vector.broadcast %cst_115 : f32 to vector<16x1xf32>
    %329 = arith.divf %327, %328 : vector<16x1xf32>
    %330 = vector.broadcast %322 : vector<16x1xf32> to vector<16x32xf32>
    %331 = arith.subf %316, %330 : vector<16x32xf32>
    %cst_116 = arith.constant 9.99999996E-13 : f32
    %332 = vector.broadcast %cst_116 : f32 to vector<16x1xf32>
    %333 = arith.addf %329, %332 : vector<16x1xf32>
    %334 = math.rsqrt %333 : vector<16x1xf32>
    %335 = vector.broadcast %334 : vector<16x1xf32> to vector<16x32xf32>
    %336 = arith.mulf %331, %335 : vector<16x32xf32>
    %337 = vector.broadcast %317 : vector<1x32xf32> to vector<16x32xf32>
    %338 = arith.mulf %336, %337 : vector<16x32xf32>
    %339 = vector.broadcast %318 : vector<1x32xf32> to vector<16x32xf32>
    %340 = arith.addf %338, %339 : vector<16x32xf32>
    %341 = vector.extract_strided_slice %340 {offsets = [0, 0], sizes = [1, 32], strides = [1, 1]} : vector<16x32xf32> to vector<1x32xf32>
    %342 = vector.extract_strided_slice %340 {offsets = [8, 0], sizes = [1, 32], strides = [1, 1]} : vector<16x32xf32> to vector<1x32xf32>
    %343 = tpu.concatenate %341, %342 in 0 : vector<1x32xf32>, vector<1x32xf32> -> vector<2x32xf32>
    %c320 = arith.constant 320 : index
    %c0_117 = arith.constant 0 : index
    %344 = vector.load %arg3[%c320, %c0_117] : memref<384x128xbf16, #tpu.memory_space<vmem>>, vector<32x32xbf16>
    %345 = arith.truncf %343 : vector<2x32xf32> to vector<2x32xbf16>
    %cst_118 = arith.constant dense<0.000000e+00> : vector<2x32xf32>
    %346 = tpu.matmul %345, %344, %cst_118 {dimension_numbers = #tpu.dot_dimension_numbers<[1], [0], [0], [1], [0, 0, 1, 1], [], []>} : vector<2x32xbf16>, vector<32x32xbf16>, vector<2x32xf32> -> vector<2x32xf32>
    %c26 = arith.constant 26 : index
    %c0_119 = arith.constant 0 : index
    %347 = vector.load %arg4[%c26, %c0_119] : memref<32x128xf32, #tpu.memory_space<vmem>>, vector<1x32xf32>
    %348 = vector.broadcast %347 : vector<1x32xf32> to vector<2x32xf32>
    %349 = arith.addf %346, %348 : vector<2x32xf32>
    %350 = math.tanh %349 : vector<2x32xf32>
    %c352 = arith.constant 352 : index
    %c0_120 = arith.constant 0 : index
    %351 = vector.load %arg3[%c352, %c0_120] : memref<384x128xbf16, #tpu.memory_space<vmem>>, vector<32x128xbf16>
    %352 = arith.truncf %350 : vector<2x32xf32> to vector<2x32xbf16>
    %cst_121 = arith.constant dense<0.000000e+00> : vector<2x128xf32>
    %353 = tpu.matmul %352, %351, %cst_121 {dimension_numbers = #tpu.dot_dimension_numbers<[1], [0], [0], [1], [0, 0, 1, 1], [], []>} : vector<2x32xbf16>, vector<32x128xbf16>, vector<2x128xf32> -> vector<2x128xf32>
    %c27 = arith.constant 27 : index
    %c0_122 = arith.constant 0 : index
    %354 = vector.load %arg4[%c27, %c0_122] : memref<32x128xf32, #tpu.memory_space<vmem>>, vector<1x128xf32>
    %355 = vector.broadcast %354 : vector<1x128xf32> to vector<2x128xf32>
    %356 = arith.addf %353, %355 : vector<2x128xf32>
    %cst_123 = arith.constant dense<0xFF800000> : vector<2xf32>
    %357 = vector.multi_reduction <maximumf>, %356, %cst_123 [1] : vector<2x128xf32> to vector<2xf32>
    %358 = vector.shape_cast %357 : vector<2xf32> to vector<2x1xf32>
    %359 = vector.broadcast %358 : vector<2x1xf32> to vector<2x128xf32>
    %360 = arith.subf %356, %359 : vector<2x128xf32>
    %361 = math.exp %360 : vector<2x128xf32>
    %cst_124 = arith.constant dense<0.000000e+00> : vector<2xf32>
    %362 = vector.multi_reduction <add>, %361, %cst_124 [1] : vector<2x128xf32> to vector<2xf32>
    %363 = vector.shape_cast %362 : vector<2xf32> to vector<2x1xf32>
    %364 = vector.broadcast %363 : vector<2x1xf32> to vector<2x128xf32>
    %365 = arith.divf %361, %364 : vector<2x128xf32>
    %c0_125 = arith.constant 0 : index
    %c0_126 = arith.constant 0 : index
    %366 = vector.load %arg5[%c0_125, %c0_126] : memref<2x128xf32, #tpu.memory_space<vmem>>, vector<2x128xf32>
    tpu.vector_store %arg5[%c0_125, %c0_126], %365 {strides = array<i32>} : memref<2x128xf32, #tpu.memory_space<vmem>>, vector<2x128xf32>,
    return
  }
}

</mosaic_0001>

<bundles_post_ra>
// kernel: tpu_custom_call.1
= control target key start
LH: loop header
LB: loop body
LE: loop exit
PB: predicated region body
PF: predicated region fallthrough
CT: control target
= control target key end

     0   :  { %10 = vsyncpa [#allocation5], 0  ;;  %s3102_s0 = inlined_call_operand.vmem [shape: s32[16], index: 0, kind: input, shape index: {}]   ;;  %s3103_s1 = inlined_call_operand.vmem [shape: s32[2,8], index: 1, kind: input, shape index: {}]   ;;  %s3104_s2 = inlined_call_operand.vmem [shape: f32[100,32], index: 2, kind: input, shape index: {}]   ;;  %s3105_s3 = inlined_call_operand.hbm [shape: bf16[384,128], index: 3, kind: input, shape index: {}]   ;;  %s3106_s4 = inlined_call_operand.vmem [shape: f32[32,128], index: 4, kind: input, shape index: {}]   ;;  %s3107_s5 = inlined_call_operand.hbm [shape: f32[2,128], index: 5, kind: output, shape index: {}]  }
   0x1   :  { %11 = vsyncpa [#allocation3], 0 }
   0x2   :  { %12 = vsyncpa [#allocation4], 0  ;;  %s19_s20 = sshll.u32 %s3102_s0, 4  ;;  %s20_s20 = int_to_ptr.vmem [resolvable:$true] %s19_s20 }
   0x3   :  { %s2564_s21 = scalar_lea.vmem %s20_s20, 16  ;;  %p2569_p1 = scmp.lt.s32.totalorder %s20_s20, %s20_s20 }
   0x4   :  { %p2565_p0 = scmp.ne.s32.totalorder %s20_s20, %s2564_s21  ;;  %p2570_p2 = scmp.lt.s32.totalorder %s2564_s21, %s2564_s21 }
   0x6   :  { %p2571_p3 = por %p2570_p2, %p2569_p1 }
   0x8   :  { %p2572_p4 = pnand %p2571_p3, %p2565_p0 }
   0xa   :  { %2575 = shalt.err (!%p2572_p4)
}
   0xb   :  { %s2622_s22 = smov [#allocation2]   ;;  %s2623_s23 = smov [#allocation6]  }
   0xc   :  { %22 = dma.vmem_to_smem %s20_s20, 16, %s2622_s22, [#allocation5]  }
   0xd   :  { %s32_s24 = sshll.u32 %s2623_s23, 4  ;;  %s33_s24 = int_to_ptr.vmem [resolvable:$true] %s32_s24 }
   0xe   :  { %s2584_s25 = scalar_lea.vmem %s33_s24, 3072  ;;  %p2589_p6 = scmp.lt.s32.totalorder %s33_s24, %s33_s24 }
   0xf   :  { %p2585_p5 = scmp.ne.s32.totalorder %s33_s24, %s2584_s25  ;;  %p2590_p7 = scmp.lt.s32.totalorder %s2584_s25, %s2584_s25 }
  0x11   :  { %p2591_p8 = por %p2590_p7, %p2589_p6 }
  0x13   :  { %p2592_p9 = pnand %p2591_p8, %p2585_p5 }
  0x15   :  { %2595 = shalt.err (!%p2592_p9)
}
  0x16   :  { %s2624_s0 = smov 64   ;;  %s2625_s26 = smov 4  }
  0x17   :  { %38 = dma.hbm_to_vmem [thread:$0]  %s3105_s3, 3072, %s33_s24, [#allocation3], %s2624_s0, %s2624_s0, %s2625_s26  }
  0x18   :  { %2616 = dma.done.wait [#allocation5], 16  }
  0x19   :  { %2617 = vsyncadd [#allocation5], 4294967280 }
  0x1a   :  { %2618 = dma.done.wait [#allocation3], 3072  }
  0x1b   :  { %2619 = vsyncadd [#allocation3], 4294964224 }
  0x1c   :  { %47 = sfence }
  0x1d   :  { %s49_s29 = sld [smem:[#allocation2]]  ;;  %vm139_vm0 = vcmask 1040384   ;;  %vm141_vm1 = vcmask 1041408   ;;  %vm143_vm2 = vcmask 1042432   ;;  %vm145_vm3 = vcmask 1043456   ;;  %v160_v20 = vld [vmem:[%s3106_s4] sm:$0xff] }
  0x1e   :  { %s2108_s30 = sld [smem:[#allocation2 + $0x1]]  ;;  %vm147_vm4 = vcmask 1044480   ;;  %vm149_vm5 = vcmask 1045504   ;;  %vm151_vm6 = vcmask 1046528   ;;  %vm165_vm7 = vcmask 261120   ;;  %v2474_v59 = vld [vmem:[#allocation6 + $0x8] sm:$0xff]  }
  0x1f   :  { %s2109_s6 = sld [smem:[#allocation2 + $0x2]]  ;;  %v2626_v60 = vmov 0.0   ;;  %vm2627_vm8 = vmmov 0   ;;  %v2475_v61 = vld [vmem:[#allocation6] sm:$0xff]   ;;  %vm306_vm9 = vcmask 130048   ;;  %vm415_vm10 = vcmask 64512  }
  0x20   :  { %s2110_s7 = sld [smem:[#allocation2 + $0x3]]  ;;  %2267 = vmatprep.subr.bf16.mxu0 %v2626_v60  ;;  %2271 = vmatprep.mubr.msk.bf16.mxu0 %vm2627_vm8, %v2626_v60  ;;  %vm1000_vm11 = vcmask 523264  }
  0x21   :  { %s2111_s8 = sld [smem:[#allocation2 + $0x4]]  ;;  %2268 = vmatpush3.bf16.msra.mxu0 %v2474_v59  ;;  %2275 = vmatprep.subr.bf16.mxu1 %v2626_v60 }
  0x22   :  { %s2112_s9 = sld [smem:[#allocation2 + $0x5]]  ;;  %2269 = vmatprep.subr.bf16.mxu0 %v2626_v60  ;;  %2277 = vmatprep.mubr.msk.bf16.mxu1 %vm2627_vm8, %v2626_v60 }
  0x23   :  { %s50_s12 = scalar_lea.vmem %s3104_s2, %s49_s29  ;;  %s2676_s13 = sld [smem:[#allocation2 + $0x6]] }
  0x24   :  { %v51_v0 = vld [vmem:[%s50_s12] sm:$0x1]  ;;  %s53_s15 = scalar_lea.vmem %s3104_s2, %s2108_s30  ;;  %s2681_s16 = sld [smem:[#allocation2 + $0x7]] }
  0x25   :  { %v54_v1 = vld [vmem:[%s53_s15] sm:$0x1]  ;;  %s56_s19 = scalar_lea.vmem %s3104_s2, %s2109_s6  ;;  %s2686_s20 = sld [smem:[#allocation2 + $0x8]]  ;;  %2270 = vmatpush3.bf16.msra.mxu0 %v2475_v61 }
  0x26   :  { %v57_v2 = vld [vmem:[%s56_s19] sm:$0x1]  ;;  %s59_s23 = scalar_lea.vmem %s3104_s2, %s2110_s7  ;;  %v98_v3 = vrot.slane %v54_v1, 7  ;;  %s2691_s24 = sld [smem:[#allocation2 + $0x9]]  ;;  %2281 = vmatprep.subr.bf16.mxu0 %v2626_v60 }
  0x27   :  { %v60_v4 = vld [vmem:[%s59_s23] sm:$0x1]  ;;  %s62_s27 = scalar_lea.vmem %s3104_s2, %s2111_s8  ;;  %v101_v5 = vrot.slane %v57_v2, 6  ;;  %s2696_s28 = sld [smem:[#allocation2 + $0xa]] }
  0x28   :  { %v63_v6 = vld [vmem:[%s62_s27] sm:$0x1]  ;;  %s65_s6 = scalar_lea.vmem %s3104_s2, %s2112_s9  ;;  %v104_v7 = vrot.slane %v60_v4, 5  ;;  %v140_v8 = vsel %vm139_vm0, %v51_v0, %v98_v3  ;;  %s2702_s7 = sld [smem:[#allocation2 + $0xb]] }
  0x29   :  { %v66_v9 = vld [vmem:[%s65_s6] sm:$0x1]  ;;  %s68_s8 = scalar_lea.vmem %s3104_s2, %s2676_s13  ;;  %v107_v10 = vrot.slane %v63_v6, 4  ;;  %v142_v11 = vsel %vm141_vm1, %v140_v8, %v101_v5  ;;  %s2709_s12 = sld [smem:[#allocation2 + $0xc]]  ;;  %v2123_v6 = vld [vmem:[%s3106_s4 + $0x8] ss:$0 sm:$0xff] }
  0x2a   :  { %v69_v12 = vld [vmem:[%s68_s8] sm:$0x1]  ;;  %s71_s14 = scalar_lea.vmem %s3104_s2, %s2681_s16  ;;  %v110_v13 = vrot.slane %v66_v9, 3  ;;  %v144_v14 = vsel %vm143_vm2, %v142_v11, %v104_v7  ;;  %s2716_s15 = sld [smem:[#allocation2 + $0xd]] }
  0x2b   :  { %v72_v15 = vld [vmem:[%s71_s14] sm:$0x1]  ;;  %v113_v16 = vrot.slane %v69_v12, 2  ;;  %v146_v17 = vsel %vm145_vm3, %v144_v14, %v107_v10  ;;  %s74_s18 = scalar_lea.vmem %s3104_s2, %s2686_s20  ;;  %s2723_s19 = sld [smem:[#allocation2 + $0xe]]  ;;  %v2124_v10 = vld [vmem:[%s3106_s4 + $0x9] ss:$0 sm:$0xff] }
  0x2c   :  { %v116_v18 = vrot.slane %v72_v15, 1  ;;  %v148_v19 = vsel %vm147_vm4, %v146_v17, %v110_v13  ;;  %v75_v21 = vld [vmem:[%s74_s18] sm:$0x1]  ;;  %s77_s25 = scalar_lea.vmem %s3104_s2, %s2691_s24  ;;  %s2122_s26 = sld [smem:[#allocation2 + $0xf]]  ;;  %v2125_v15 = vld [vmem:[%s3106_s4 + $0xa] ss:$0 sm:$0xff] }
  0x2d   :  { %v150_v22 = vsel %vm149_vm5, %v148_v19, %v113_v16  ;;  %v78_v23 = vld [vmem:[%s77_s25] sm:$0x1]  ;;  %s80_s29 = scalar_lea.vmem %s3104_s2, %s2696_s28  ;;  %s2628_s23 = smov 96  }
  0x2e   :  { %v152_v24 = vsel %vm151_vm6, %v150_v22, %v116_v18  ;;  %v81_v25 = vld [vmem:[%s80_s29] sm:$0x1]  ;;  %s83_s10 = scalar_lea.vmem %s3104_s2, %s2702_s7  ;;  %v119_v26 = vrot.slane %v78_v23, 7  ;;  %s2631_s20 = smov 112  }
  0x2f   :  { %v161_v27 = vadd.f32 %v160_v20, %v152_v24  ;;  %v84_v28 = vld [vmem:[%s83_s10] sm:$0x1]  ;;  %s86_s8 = scalar_lea.vmem %s3104_s2, %s2709_s12  ;;  %v122_v29 = vrot.slane %v81_v25, 6  ;;  %s2632_s27 = smov 48  }
  0x30   :  { %v87_v30 = vld [vmem:[%s86_s8] sm:$0x1]  ;;  %s89_s3 = scalar_lea.vmem %s3104_s2, %s2716_s15  ;;  %v125_v31 = vrot.slane %v84_v28, 5  ;;  %v153_v32 = vsel %vm139_vm0, %v75_v21, %v119_v26  ;;  %s2633_s29 = smov 16  }
  0x31   :  { %v166_v33 = vsel %vm165_vm7, %v161_v27, 0.0  ;;  %v90_v34 = vld [vmem:[%s89_s3] sm:$0x1]  ;;  %s92_s13 = scalar_lea.vmem %s3104_s2, %s2723_s19  ;;  %v128_v35 = vrot.slane %v87_v30, 4  ;;  %v154_v36 = vsel %vm141_vm1, %v153_v32, %v122_v29  ;;  %v2629_v30 = vmov 1966171168  }
  0x32   :  { %167 = vadd.xlane.f32.xlu0 %v166_v33  ;;  %v93_v37 = vld [vmem:[%s92_s13] sm:$0x1]  ;;  %s95_s18 = scalar_lea.vmem %s3104_s2, %s2122_s26  ;;  %v131_v38 = vrot.slane %v90_v34, 3  ;;  %v155_v39 = vsel %vm143_vm2, %v154_v36, %v125_v31  ;;  %v211_v31 = vunpack.c.l.s4 %v2629_v30  ;;  %v213_v32 = vlaneseq  ;;  %s2634_s8 = smov [#allocation7]  }
  0x33   :  { %v96_v40 = vld [vmem:[%s95_s18] sm:$0x1]  ;;  %v134_v41 = vrot.slane %v93_v37, 2  ;;  %v156_v42 = vsel %vm145_vm3, %v155_v39, %v128_v35 }
  0x34   :  { %v137_v43 = vrot.slane %v96_v40, 1  ;;  %v157_v44 = vsel %vm147_vm4, %v156_v42, %v131_v38  ;;  %v205_v28 = vld [vmem:[%s3103_s1] sm:$0x3]  ;;  %v212_v34 = vunpack.c.0.s8 %v211_v31  ;;  %v214_v35 = vshrl.u32 %v213_v32, 7  ;;  %s2630_s1 = smov 80  }
  0x35   :  { %v158_v45 = vsel %vm149_vm5, %v157_v44, %v134_v41  ;;  %v206_v29 = vcvt.s32.f32 %v205_v28 }
  0x36   :  { %v159_v46 = vsel %vm151_vm6, %v158_v45, %v137_v43  ;;  %v215_v37 = vsub.s32 %v212_v34, %v214_v35  ;;  %v405_v40 = vsub.s32 0, %v214_v35 }
  0x37   :  { %v162_v47 = vadd.f32 %v160_v20, %v159_v46  ;;  %v207_v33 = vsub.f32 1.0, %v206_v29 }
  0x39   :  { %v169_v48 = vsel %vm165_vm7, %v162_v47, 0.0  ;;  %v208_v36 = vmul.f32 -1e+09, %v207_v33 }
  0x3a   :  { %170 = vadd.xlane.f32.xlu0 %v169_v48 }
  0x3b   :  { %v216_v38 = vrot.slane %v208_v36, %v215_v37 }
  0x3d   :  { %v224_v39 = vrot.slane %v216_v38, %v215_v37  ;;  %v217_v41 = vcombine.high %v216_v38, %v216_v38 }
  0x3f   :  { %v2818_v42 = vrot.slane %v224_v39, %v405_v40  ;;  %v231_v43 = vrot.slane %v217_v41, %v215_v37 }
  0x41   :  { %v2821_v48 = vrot.slane %v231_v43, %v405_v40 }
  0xbb   :  { %v168_v49 = vpop.xlane.xlu0 %167 }
  0xbc   :  { %v173_v50 = vmul.f32 0.03125, %v168_v49 }
  0xbe   :  { %v175_v51 = vsub.f32 %v161_v27, %v173_v50 }
  0xc0   :  { %v177_v52 = vmul.f32 %v175_v51, %v175_v51 }
  0xc2   :  { %v179_v53 = vsel %vm165_vm7, %v177_v52, 0.0 }
  0xc3   :  { %v171_v54 = vpop.xlane.xlu0 %170  ;;  %180 = vadd.xlane.f32.xlu1 %v179_v53 }
  0xc4   :  { %v174_v55 = vmul.f32 0.03125, %v171_v54 }
  0xc6   :  { %v176_v56 = vsub.f32 %v162_v47, %v174_v55 }
  0xc8   :  { %v178_v57 = vmul.f32 %v176_v56, %v176_v56 }
  0xca   :  { %v182_v58 = vsel %vm165_vm7, %v178_v57, 0.0 }
  0xcb   :  { %183 = vadd.xlane.f32.xlu1 %v182_v58 }
 0x14c   :  { %v181_v62 = vpop.xlane.xlu1 %180 }
 0x14d   :  { %v185_v63 = vmul.f32 0.03125, %v181_v62 }
 0x14f   :  { %v187_v0 = vadd.f32 1e-12, %v185_v63 }
 0x151   :  { %2498 = vrsqrt.f32 %v187_v0 }
 0x154   :  { %v184_v1 = vpop.xlane.xlu1 %183 }
 0x155   :  { %v186_v2 = vmul.f32 0.03125, %v184_v1 }
 0x157   :  { %v188_v3 = vadd.f32 1e-12, %v186_v2 }
 0x159   :  { %2500 = vrsqrt.f32 %v188_v3 }
 0x15e   :  { %v2499_v4 = vpop.eup %2498 }
 0x15f   :  { %v191_v5 = vmul.f32 %v2499_v4, %v175_v51 }
 0x161   :  { %v197_v9 = vmul.f32 %v2123_v6, %v191_v5 }
 0x163   :  { %v2783_v12 = vadd.f32 %v2124_v10, %v197_v9 }
 0x166   :  { %v2501_v7 = vpop.eup %2500 }
 0x167   :  { %v192_v8 = vmul.f32 %v2501_v7, %v176_v56 }
 0x169   :  { %v198_v11 = vmul.f32 %v2123_v6, %v192_v8 }
 0x16b   :  { %v2785_v13 = vadd.f32 %v2124_v10, %v198_v11 }
 0x16d   :  { %v236_v14 = vpack.c.bf16 %v2785_v13, %v2783_v12 }
 0x16f   :  { %2272 = vmatmul.mubr.msk.bf16.vlgmr.msra.gmra.mxu0 %vm165_vm7, %v236_v14 }
 0x170   :  { %2283 = vmatprep.mubr.msk.bf16.mxu0 %vm2627_vm8, %v2626_v60 }
 0x22f   :  { %v291_v16 = vpop.f32.mrf.mxu0 }
 0x230   :  { %v292_v17 = vadd.f32 %v2125_v15, %v291_v16 }
 0x231   :  { %v2273_v18 = vpop.f32.mrf.mxu0 }
 0x232   :  { %v2795_v19 = vpack.c.bf16 %v292_v17, %v292_v17 }
 0x233   :  { %v294_v20 = vpop.f32.mrf.mxu0 }
 0x234   :  { %v295_v21 = vadd.f32 %v2125_v15, %v294_v20  ;;  %304 = vrot.lane.b32.xlu0 %v2795_v19, %s2628_s23 }
 0x235   :  { %v2274_v22 = vpop.f32.mrf.mxu0 }
 0x236   :  { %v2799_v23 = vpack.c.bf16 %v295_v21, %v295_v21 }
 0x238   :  { %353 = vrot.lane.b32.xlu1 %v2799_v23, %s2628_s23 }
 0x2a6   :  { %v305_v24 = vpop.permute.xlu0 %304 }
 0x2a7   :  { %v311_v25 = vsel %vm306_vm9, %v305_v24, 0 }
 0x2a8   :  { %2276 = vmatpush3.bf16.xpose.msra.mxu1 %v311_v25 }
 0x2a9   :  { %2287 = vmatprep.subr.bf16.mxu1 %v2626_v60 }
 0x2aa   :  { %v354_v26 = vpop.permute.xlu1 %353 }
 0x2ab   :  { %v359_v27 = vsel %vm306_vm9, %v354_v26, 0 }
 0x2ac   :  { %2282 = vmatpush3.bf16.xpose.msra.mxu0 %v359_v27 }
 0x2ad   :  { %2293 = vmatprep.subr.bf16.mxu0 %v2626_v60 }
 0x2af   :  { %2278 = vmatmul.mubr.msk.bf16.vlgmr.msra.gmra.mxu1 %vm306_vm9, %v2795_v19 }
 0x2b0   :  { %2289 = vmatprep.mubr.msk.bf16.mxu1 %vm2627_vm8, %v2626_v60 }
 0x2b3   :  { %2284 = vmatmul.mubr.msk.bf16.vlgmr.msra.gmra.mxu0 %vm306_vm9, %v2799_v23 }
 0x2b4   :  { %2295 = vmatprep.mubr.msk.bf16.mxu0 %vm2627_vm8, %v2626_v60 }
 0x36f   :  { %v347_v44 = vpop.f32.mrf.mxu1 }
 0x370   :  { %v401_v45 = vmul.f32 0.25, %v347_v44 }
 0x371   :  { %v2279_v46 = vpop.f32.mrf.mxu1 }
 0x372   :  { %v413_v47 = vadd.f32 %v2818_v42, %v401_v45 }
 0x373   :  { %v350_v49 = vpop.f32.mrf.mxu1  ;;  %v395_v50 = vpop.f32.mrf.mxu0 }
 0x374   :  { %v402_v51 = vmul.f32 0.25, %v395_v50  ;;  %v416_v52 = vsel %vm415_vm10, %v413_v47, -inf }
 0x375   :  { %v2280_v53 = vpop.f32.mrf.mxu1  ;;  %417 = vmax.xlane.f32.xlu1 %v416_v52  ;;  %v2285_v54 = vpop.f32.mrf.mxu0 }
 0x376   :  { %v414_v55 = vadd.f32 %v2821_v48, %v402_v51 }
 0x377   :  { %v398_v56 = vpop.f32.mrf.mxu0 }
 0x378   :  { %v419_v57 = vsel %vm415_vm10, %v414_v55, -inf }
 0x379   :  { %420 = vmax.xlane.f32.xlu0 %v419_v57  ;;  %v2286_v58 = vpop.f32.mrf.mxu0 }
 0x386   :  { %488 = vrot.lane.b32.xlu1 %v2799_v23, %s2624_s0 }
 0x38a   :  { %538 = vrot.lane.b32.xlu1 %v2795_v19, %s2630_s1 }
 0x3fe   :  { %v418_v59 = vpop.xlane.xlu1 %417 }
 0x3ff   :  { %v422_v61 = vsub.f32 %v413_v47, %v418_v59 }
 0x401   :  { %v424_v62 = vmul.f32 1.442695, %v422_v61 }
 0x402   :  { %v489_v63 = vpop.permute.xlu1 %488  ;;  %v421_v0 = vpop.xlane.xlu0 %420 }
 0x403   :  { %2502 = vpow2.f32 %v424_v62  ;;  %v494_v1 = vsel %vm145_vm3, %v489_v63, 0  ;;  %v423_v2 = vsub.f32 %v414_v55, %v421_v0 }
 0x404   :  { %2294 = vmatpush3.bf16.msra.mxu0 %v494_v1 }
 0x405   :  { %v426_v3 = vmul.f32 1.442695, %v423_v2  ;;  %2305 = vmatprep.subr.bf16.mxu0 %v2626_v60 }
 0x406   :  { %v539_v8 = vpop.permute.xlu1 %538 }
 0x407   :  { %2504 = vpow2.f32 %v426_v3  ;;  %v544_v20 = vsel %vm306_vm9, %v539_v8, 0 }
 0x410   :  { %v2503_v4 = vpop.eup %2502 }
 0x411   :  { %v428_v5 = vsel %vm415_vm10, %v2503_v4, 0.0 }
 0x412   :  { %429 = vadd.xlane.f32.xlu0 %v428_v5 }
 0x414   :  { %v2505_v6 = vpop.eup %2504 }
 0x415   :  { %v431_v7 = vsel %vm415_vm10, %v2505_v6, 0.0 }
 0x416   :  { %432 = vadd.xlane.f32.xlu1 %v431_v7 }
 0x427   :  { %588 = vrot.lane.b32.xlu1 %v2799_v23, %s2630_s1 }
 0x428   :  { %440 = vrot.lane.b32.xlu0 %v2795_v19, %s2624_s0 }
 0x42b   :  { %586 = vrot.lane.b32.xlu1 %v2799_v23, %s2631_s20 }
 0x42c   :  { %536 = vrot.lane.b32.xlu0 %v2795_v19, %s2631_s20 }
 0x49b   :  { %v430_v9 = vpop.xlane.xlu0 %429 }
 0x49c   :  { %2506 = vrcp.f32 %v430_v9  ;;  %v2476_v9 = vld [vmem:[#allocation6 + $0x18] sm:$0xff]  }
 0x49f   :  { %v433_v10 = vpop.xlane.xlu1 %432  ;;  %v441_v11 = vpop.permute.xlu0 %440 }
 0x4a0   :  { %2508 = vrcp.f32 %v433_v10  ;;  %v446_v14 = vsel %vm145_vm3, %v441_v11, 0  ;;  %v2477_v10 = vld [vmem:[#allocation6 + $0x10] sm:$0xff]  }
 0x4a1   :  { %2288 = vmatpush3.bf16.msra.mxu1 %v446_v14 }
 0x4a2   :  { %2299 = vmatprep.subr.bf16.mxu1 %v2626_v60 }
 0x4a3   :  { %v589_v22 = vpop.permute.xlu1 %588  ;;  %v537_v26 = vpop.permute.xlu0 %536 }
 0x4a4   :  { %v594_v25 = vsel %vm306_vm9, %v589_v22, 0 }
 0x4a7   :  { %v587_v27 = vpop.permute.xlu1 %586 }
 0x4a9   :  { %v2507_v15 = vpop.eup %2506 }
 0x4aa   :  { %v435_v16 = vmul.f32 %v2507_v15, %v2503_v4 }
 0x4ac   :  { %v438_v17 = vpack.c.bf16 %v435_v16, %v435_v16 }
 0x4ad   :  { %v2509_v18 = vpop.eup %2508 }
 0x4ae   :  { %2290 = vmatmul.mubr.msk.bf16.vlgmr.msra.gmra.mxu1 %vm415_vm10, %v438_v17  ;;  %v437_v21 = vmul.f32 %v2509_v18, %v2505_v6 }
 0x4af   :  { %2300 = vmatpush3.bf16.xpose.msra.mxu1 %v544_v20  ;;  %2301 = vmatprep.mubr.msk.bf16.mxu1 %vm2627_vm8, %v2626_v60 }
 0x4b0   :  { %v439_v24 = vpack.c.bf16 %v437_v21, %v437_v21  ;;  %2311 = vmatprep.subr.bf16.mxu1 %v2626_v60 }
 0x4b2   :  { %2296 = vmatmul.mubr.msk.bf16.vlgmr.msra.gmra.mxu0 %vm415_vm10, %v439_v24 }
 0x4b3   :  { %2306 = vmatpush3.bf16.xpose.msra.mxu0 %v594_v25  ;;  %2307 = vmatprep.mubr.msk.bf16.mxu0 %vm2627_vm8, %v2626_v60 }
 0x4b4   :  { %2317 = vmatprep.subr.bf16.mxu0 %v2626_v60 }
 0x4b6   :  { %2302 = vmatmul.mubr.msk.bf16.vlgmr.msra.gmra.mxu1 %vm306_vm9, %v537_v26 }
 0x4b7   :  { %2313 = vmatprep.mubr.msk.bf16.mxu1 %vm2627_vm8, %v2626_v60 }
 0x4ba   :  { %2308 = vmatmul.mubr.msk.bf16.vlgmr.msra.gmra.mxu0 %vm306_vm9, %v587_v27 }
 0x4bb   :  { %2319 = vmatprep.mubr.msk.bf16.mxu0 %vm2627_vm8, %v2626_v60 }
 0x56e   :  { %v2860_v28 = vpop.f32.mrf.mxu1 }
 0x570   :  { %v2291_v29 = vpop.f32.mrf.mxu1 }
 0x572   :  { %v485_v30 = vpop.f32.mrf.mxu1  ;;  %v2862_v31 = vpop.f32.mrf.mxu0 }
 0x574   :  { %v2292_v32 = vpop.f32.mrf.mxu1  ;;  %v2297_v33 = vpop.f32.mrf.mxu0 }
 0x575   :  { %v2139_v32 = vld [vmem:[%s3106_s4 + $0xb] ss:$0 sm:$0xff] }
 0x576   :  { %v533_v34 = vpop.f32.mrf.mxu0  ;;  %v580_v35 = vpop.f32.mrf.mxu1 }
 0x577   :  { %v636_v36 = vmul.f32 0.25, %v580_v35 }
 0x578   :  { %v2298_v37 = vpop.f32.mrf.mxu0  ;;  %v2303_v38 = vpop.f32.mrf.mxu1 }
 0x579   :  { %v638_v39 = vadd.f32 %v636_v36, %v2818_v42 }
 0x57a   :  { %v583_v40 = vpop.f32.mrf.mxu1  ;;  %v630_v41 = vpop.f32.mrf.mxu0 }
 0x57b   :  { %v637_v43 = vmul.f32 0.25, %v630_v41  ;;  %v640_v44 = vsel %vm415_vm10, %v638_v39, -inf }
 0x57c   :  { %641 = vmax.xlane.f32.xlu0 %v640_v44  ;;  %v2304_v45 = vpop.f32.mrf.mxu1  ;;  %v2309_v46 = vpop.f32.mrf.mxu0 }
 0x57d   :  { %v639_v47 = vadd.f32 %v637_v43, %v2821_v48 }
 0x57e   :  { %v633_v49 = vpop.f32.mrf.mxu0 }
 0x57f   :  { %v643_v50 = vsel %vm415_vm10, %v639_v47, -inf }
 0x580   :  { %644 = vmax.xlane.f32.xlu1 %v643_v50  ;;  %v2310_v51 = vpop.f32.mrf.mxu0 }
 0x591   :  { %712 = vrot.lane.b32.xlu1 %v2799_v23, %s2632_s27 }
 0x605   :  { %v642_v52 = vpop.xlane.xlu0 %641 }
 0x606   :  { %v646_v53 = vsub.f32 %v638_v39, %v642_v52  ;;  %v2478_v52 = vld [vmem:[#allocation6 + $0x28] sm:$0xff]  }
 0x608   :  { %v648_v54 = vmul.f32 1.442695, %v646_v53 }
 0x609   :  { %v645_v55 = vpop.xlane.xlu1 %644 }
 0x60a   :  { %2510 = vpow2.f32 %v648_v54  ;;  %v647_v56 = vsub.f32 %v639_v47, %v645_v55 }
 0x60c   :  { %v650_v57 = vmul.f32 1.442695, %v647_v56 }
 0x60d   :  { %v713_v58 = vpop.permute.xlu1 %712 }
 0x60e   :  { %2512 = vpow2.f32 %v650_v57  ;;  %v718_v59 = vsel %vm145_vm3, %v713_v58, 0 }
 0x60f   :  { %2318 = vmatpush3.bf16.msra.mxu0 %v718_v59 }
 0x610   :  { %2331 = vmatprep.subr.bf16.mxu0 %v2626_v60 }
 0x617   :  { %v2511_v61 = vpop.eup %2510 }
 0x618   :  { %v652_v62 = vsel %vm415_vm10, %v2511_v61, 0.0 }
 0x619   :  { %653 = vadd.xlane.f32.xlu0 %v652_v62  ;;  %v2143_v62 = vld [vmem:[%s3106_s4 + $0xc] ss:$0 sm:$0xff] }
 0x61b   :  { %v2513_v63 = vpop.eup %2512 }
 0x61c   :  { %v655_v23 = vsel %vm415_vm10, %v2513_v63, 0.0 }
 0x61d   :  { %656 = vadd.xlane.f32.xlu0 %v655_v23 }
 0x633   :  { %664 = vrot.lane.b32.xlu0 %v2795_v19, %s2632_s27 }
 0x6a2   :  { %v654_v0 = vpop.xlane.xlu0 %653 }
 0x6a3   :  { %2514 = vrcp.f32 %v654_v0 }
 0x6a6   :  { %v657_v1 = vpop.xlane.xlu0 %656 }
 0x6a7   :  { %2516 = vrcp.f32 %v657_v1  ;;  %v2144_v1 = vld [vmem:[%s3106_s4 + $0xd] ss:$0 sm:$0xff] }
 0x6aa   :  { %v665_v2 = vpop.permute.xlu0 %664 }
 0x6ab   :  { %v670_v3 = vsel %vm145_vm3, %v665_v2, 0 }
 0x6ac   :  { %2312 = vmatpush3.bf16.msra.mxu1 %v670_v3 }
 0x6ad   :  { %2323 = vmatprep.subr.bf16.mxu1 %v2626_v60 }
 0x6b0   :  { %v2515_v4 = vpop.eup %2514 }
 0x6b1   :  { %v659_v5 = vmul.f32 %v2515_v4, %v2511_v61 }
 0x6b3   :  { %v662_v6 = vpack.c.bf16 %v659_v5, %v659_v5 }
 0x6b4   :  { %v2517_v7 = vpop.eup %2516 }
 0x6b5   :  { %2314 = vmatmul.mubr.msk.bf16.vlgmr.msra.gmra.mxu1 %vm415_vm10, %v662_v6  ;;  %v661_v8 = vmul.f32 %v2517_v7, %v2513_v63  ;;  %v2480_v6 = vld [vmem:[#allocation6 + $0x48] sm:$0xff]   ;;  %v2481_v7 = vld [vmem:[#allocation6 + $0x40] sm:$0xff]  }
 0x6b6   :  { %2327 = vmatprep.mubr.msk.bf16.mxu1 %vm2627_vm8, %v2626_v60  ;;  %2324 = vmatpush3.bf16.msra.mxu1 %v2476_v9  ;;  %v2145_v9 = vld [vmem:[%s3106_s4 + $0xe] ss:$0 sm:$0xff] }
 0x6b7   :  { %v663_v19 = vpack.c.bf16 %v661_v8, %v661_v8  ;;  %2325 = vmatprep.subr.bf16.mxu1 %v2626_v60  ;;  %v2482_v8 = vld [vmem:[#allocation6 + $0x38] sm:$0xff]  }
 0x6b9   :  { %2320 = vmatmul.mubr.msk.bf16.vlgmr.msra.gmra.mxu0 %vm415_vm10, %v663_v19  ;;  %v2483_v19 = vld [vmem:[#allocation6 + $0x30] sm:$0xff]  }
 0x6ba   :  { %2335 = vmatprep.mubr.msk.bf16.mxu0 %vm2627_vm8, %v2626_v60  ;;  %2326 = vmatpush3.bf16.msra.mxu1 %v2477_v10 }
 0x6bb   :  { %2339 = vmatprep.subr.bf16.mxu1 %v2626_v60  ;;  %2332 = vmatpush3.bf16.msra.mxu0 %v2478_v52 }
 0x6bc   :  { %2333 = vmatprep.subr.bf16.mxu0 %v2626_v60 }
 0x775   :  { %v706_v11 = vpop.f32.mrf.mxu1 }
 0x777   :  { %v2315_v14 = vpop.f32.mrf.mxu1 }
 0x779   :  { %v709_v15 = vpop.f32.mrf.mxu1  ;;  %v754_v16 = vpop.f32.mrf.mxu0 }
 0x77a   :  { %v2464_v17 = vpack.i.bf16 %v754_v16, %v706_v11 }
 0x77b   :  { %v2316_v18 = vpop.f32.mrf.mxu1  ;;  %v2321_v20 = vpop.f32.mrf.mxu0 }
 0x77c   :  { %2465 = vrot.lane.b32.xlu1 %v2464_v17, %s2633_s29 }
 0x77d   :  { %v757_v21 = vpop.f32.mrf.mxu0 }
 0x77f   :  { %v2322_v22 = vpop.f32.mrf.mxu0 }
 0x7ee   :  { %v2466_v24 = vpop.permute.xlu1 %2465 }
 0x7ef   :  { %v2468_v25 = vunpack.i.h.bf16 %v2466_v24  ;;  %v2467_v26 = vunpack.i.l.bf16 %v2466_v24 }
 0x7f1   :  { %v769_v27 = vsel %vm306_vm9, %v2862_v31, %v2468_v25  ;;  %v768_v29 = vsel %vm306_vm9, %v2860_v28, %v2467_v26 }
 0x7f2   :  { %v774_v30 = vpack.c.bf16 %v769_v27, %v768_v29 }
 0x7f4   :  { %2328 = vmatmul.mubr.msk.bf16.vlgmr.msra.gmra.mxu1 %vm165_vm7, %v774_v30 }
 0x7f5   :  { %2347 = vmatprep.mubr.msk.bf16.mxu1 %vm2627_vm8, %v2626_v60  ;;  %2340 = vmatpush3.bf16.msra.mxu1 %v2480_v6  ;;  %v2155_v6 = vld [vmem:[%s3106_s4 + $0x10] ss:$0 sm:$0xff] }
 0x7f6   :  { %2341 = vmatprep.subr.bf16.mxu1 %v2626_v60 }
 0x7f9   :  { %2342 = vmatpush3.bf16.msra.mxu1 %v2481_v7 }
 0x7fa   :  { %2343 = vmatprep.subr.bf16.mxu1 %v2626_v60 }
 0x7fd   :  { %2344 = vmatpush3.bf16.msra.mxu1 %v2482_v8 }
 0x7fe   :  { %2345 = vmatprep.subr.bf16.mxu1 %v2626_v60 }
 0x801   :  { %2346 = vmatpush3.bf16.msra.mxu1 %v2483_v19 }
 0x802   :  { %2365 = vmatprep.subr.bf16.mxu1 %v2626_v60 }
 0x8b4   :  { %v829_v33 = vpop.f32.mrf.mxu1 }
 0x8b5   :  { %v830_v34 = vadd.f32 %v2139_v32, %v829_v33 }
 0x8b6   :  { %v2329_v35 = vpop.f32.mrf.mxu1 }
 0x8b7   :  { %v836_v36 = vadd.f32 %v830_v34, %v2783_v12 }
 0x8b8   :  { %v832_v37 = vpop.f32.mrf.mxu1 }
 0x8b9   :  { %v833_v31 = vadd.f32 %v2139_v32, %v832_v37  ;;  %v840_v38 = vsel %vm165_vm7, %v836_v36, 0.0 }
 0x8ba   :  { %841 = vadd.xlane.f32.xlu1 %v840_v38  ;;  %v2330_v28 = vpop.f32.mrf.mxu1 }
 0x8bb   :  { %v837_v39 = vadd.f32 %v833_v31, %v2785_v13  ;;  %v2479_v13 = vld [vmem:[#allocation6 + $0x20] sm:$0xff]  }
 0x8bc   :  { %2334 = vmatpush3.bf16.msra.mxu0 %v2479_v13 }
 0x8bd   :  { %v843_v40 = vsel %vm165_vm7, %v837_v39, 0.0  ;;  %2351 = vmatprep.subr.bf16.mxu0 %v2626_v60 }
 0x8be   :  { %844 = vadd.xlane.f32.xlu0 %v843_v40 }
 0x943   :  { %v842_v41 = vpop.xlane.xlu1 %841 }
 0x944   :  { %v846_v43 = vmul.f32 0.03125, %v842_v41 }
 0x946   :  { %v848_v44 = vsub.f32 %v836_v36, %v846_v43 }
 0x947   :  { %v845_v45 = vpop.xlane.xlu0 %844 }
 0x948   :  { %v847_v46 = vmul.f32 0.03125, %v845_v45  ;;  %v850_v47 = vmul.f32 %v848_v44, %v848_v44 }
 0x94a   :  { %v849_v49 = vsub.f32 %v837_v39, %v847_v46  ;;  %v852_v12 = vsel %vm165_vm7, %v850_v47, 0.0  ;;  %v2149_v39 = vld [vmem:[%s3106_s4 + $0xf] ss:$0 sm:$0xff] }
 0x94b   :  { %853 = vadd.xlane.f32.xlu0 %v852_v12 }
 0x94c   :  { %v851_v50 = vmul.f32 %v849_v49, %v849_v49 }
 0x94e   :  { %v855_v51 = vsel %vm165_vm7, %v851_v50, 0.0 }
 0x94f   :  { %856 = vadd.xlane.f32.xlu0 %v855_v51 }
 0x9d4   :  { %v854_v53 = vpop.xlane.xlu0 %853 }
 0x9d5   :  { %v858_v54 = vmul.f32 0.03125, %v854_v53 }
 0x9d7   :  { %v860_v55 = vadd.f32 1e-12, %v858_v54 }
 0x9d8   :  { %v857_v56 = vpop.xlane.xlu0 %856 }
 0x9d9   :  { %2518 = vrsqrt.f32 %v860_v55  ;;  %v859_v57 = vmul.f32 0.03125, %v857_v56 }
 0x9db   :  { %v861_v58 = vadd.f32 1e-12, %v859_v57 }
 0x9dd   :  { %2520 = vrsqrt.f32 %v861_v58 }
 0x9e6   :  { %v2519_v59 = vpop.eup %2518 }
 0x9e7   :  { %v864_v61 = vmul.f32 %v2519_v59, %v848_v44 }
 0x9e9   :  { %v870_v0 = vmul.f32 %v2143_v62, %v864_v61  ;;  %v2484_v61 = vld [vmem:[#allocation6 + $0x58] sm:$0xff]  }
 0x9ea   :  { %v2521_v63 = vpop.eup %2520 }
 0x9eb   :  { %v865_v23 = vmul.f32 %v2521_v63, %v849_v49  ;;  %v876_v3 = vadd.f32 %v2144_v1, %v870_v0 }
 0x9ed   :  { %v871_v2 = vmul.f32 %v2143_v62, %v865_v23  ;;  %v2485_v62 = vld [vmem:[#allocation6 + $0x50] sm:$0xff]  }
 0x9ef   :  { %v877_v4 = vadd.f32 %v2144_v1, %v871_v2 }
 0x9f1   :  { %v890_v5 = vpack.c.bf16 %v877_v4, %v876_v3 }
 0x9f3   :  { %2336 = vmatmul.mubr.msk.bf16.vlgmr.msra.gmra.mxu0 %vm165_vm7, %v890_v5 }
 0x9f4   :  { %2355 = vmatprep.mubr.msk.bf16.mxu0 %vm2627_vm8, %v2626_v60  ;;  %2352 = vmatpush3.bf16.msra.mxu0 %v2484_v61 }
 0x9f5   :  { %2353 = vmatprep.subr.bf16.mxu0 %v2626_v60 }
 0x9f8   :  { %2354 = vmatpush3.bf16.msra.mxu0 %v2485_v62 }
 0x9f9   :  { %2359 = vmatprep.subr.bf16.mxu0 %v2626_v60 }
 0xab3   :  { %v945_v10 = vpop.f32.mrf.mxu0 }
 0xab4   :  { %v946_v11 = vadd.f32 %v2145_v9, %v945_v10 }
 0xab5   :  { %v2337_v14 = vpop.f32.mrf.mxu0 }
 0xab6   :  { %v954_v15 = vmul.f32 0.044715, %v946_v11  ;;  %v952_v35 = vmul.f32 0.5, %v946_v11 }
 0xab7   :  { %v948_v16 = vpop.f32.mrf.mxu0 }
 0xab8   :  { %v956_v17 = vmul.f32 %v954_v15, %v946_v11  ;;  %v949_v18 = vadd.f32 %v2145_v9, %v948_v16  ;;  %v2156_v9 = vld [vmem:[%s3106_s4 + $0x11] ss:$0 sm:$0xff]  ;;  %v2157_v16 = vld [vmem:[%s3106_s4 + $0x12] ss:$0 sm:$0xff] }
 0xab9   :  { %v2338_v20 = vpop.f32.mrf.mxu0 }
 0xaba   :  { %v958_v21 = vmul.f32 %v956_v17, %v946_v11  ;;  %v955_v22 = vmul.f32 0.044715, %v949_v18  ;;  %v953_v36 = vmul.f32 0.5, %v949_v18 }
 0xabc   :  { %v960_v24 = vadd.f32 %v958_v21, %v946_v11  ;;  %v957_v25 = vmul.f32 %v955_v22, %v949_v18 }
 0xabe   :  { %v962_v26 = vmul.f32 0.7978846, %v960_v24  ;;  %v959_v27 = vmul.f32 %v957_v25, %v949_v18 }
 0xac0   :  { %2522 = vtanh.f32 %v962_v26  ;;  %v961_v29 = vadd.f32 %v959_v27, %v949_v18 }
 0xac2   :  { %v963_v30 = vmul.f32 0.7978846, %v961_v29 }
 0xac4   :  { %2524 = vtanh.f32 %v963_v30 }
 0xacd   :  { %v2523_v32 = vpop.eup %2522 }
 0xace   :  { %v966_v33 = vadd.f32 1.0, %v2523_v32 }
 0xad0   :  { %v968_v31 = vmul.f32 %v966_v33, %v952_v35 }
 0xad1   :  { %v2525_v34 = vpop.eup %2524 }
 0xad2   :  { %v967_v37 = vadd.f32 1.0, %v2525_v34 }
 0xad4   :  { %v969_v38 = vmul.f32 %v967_v37, %v953_v36 }
 0xad6   :  { %v970_v28 = vpack.c.bf16 %v969_v38, %v968_v31 }
 0xad8   :  { %2348 = vmatmul.mubr.msk.bf16.vlgmr.msra.gmra.mxu1 %vm1000_vm11, %v970_v28 }
 0xad9   :  { %2367 = vmatprep.mubr.msk.bf16.mxu1 %vm2627_vm8, %v2626_v60 }
 0xb98   :  { %v1038_v40 = vpop.f32.mrf.mxu1 }
 0xb99   :  { %v1039_v41 = vadd.f32 %v2149_v39, %v1038_v40 }
 0xb9a   :  { %v2349_v43 = vpop.f32.mrf.mxu1 }
 0xb9b   :  { %v1045_v44 = vadd.f32 %v1039_v41, %v876_v3 }
 0xb9c   :  { %v1041_v45 = vpop.f32.mrf.mxu1 }
 0xb9d   :  { %v1042_v46 = vadd.f32 %v2149_v39, %v1041_v45  ;;  %v1049_v47 = vsel %vm165_vm7, %v1045_v44, 0.0 }
 0xb9e   :  { %1050 = vadd.xlane.f32.xlu1 %v1049_v47  ;;  %v2350_v49 = vpop.f32.mrf.mxu1 }
 0xb9f   :  { %v1046_v12 = vadd.f32 %v1042_v46, %v877_v4 }
 0xba1   :  { %v1052_v50 = vsel %vm165_vm7, %v1046_v12, 0.0 }
 0xba2   :  { %1053 = vadd.xlane.f32.xlu0 %v1052_v50 }
 0xc27   :  { %v1051_v51 = vpop.xlane.xlu1 %1050 }
 0xc28   :  { %v1055_v52 = vmul.f32 0.03125, %v1051_v51 }
 0xc2a   :  { %v1057_v13 = vsub.f32 %v1045_v44, %v1055_v52 }
 0xc2b   :  { %v1054_v53 = vpop.xlane.xlu0 %1053 }
 0xc2c   :  { %v1056_v54 = vmul.f32 0.03125, %v1054_v53  ;;  %v1059_v55 = vmul.f32 %v1057_v13, %v1057_v13 }
 0xc2e   :  { %v1058_v56 = vsub.f32 %v1046_v12, %v1056_v54  ;;  %v1061_v57 = vsel %vm165_vm7, %v1059_v55, 0.0 }
 0xc2f   :  { %1062 = vadd.xlane.f32.xlu1 %v1061_v57 }
 0xc30   :  { %v1060_v58 = vmul.f32 %v1058_v56, %v1058_v56 }
 0xc32   :  { %v1064_v59 = vsel %vm165_vm7, %v1060_v58, 0.0 }
 0xc33   :  { %1065 = vadd.xlane.f32.xlu0 %v1064_v59 }
 0xcb8   :  { %v1063_v63 = vpop.xlane.xlu1 %1062 }
 0xcb9   :  { %v1067_v23 = vmul.f32 0.03125, %v1063_v63 }
 0xcbb   :  { %v1069_v0 = vadd.f32 1e-12, %v1067_v23 }
 0xcbc   :  { %v1066_v1 = vpop.xlane.xlu0 %1065 }
 0xcbd   :  { %2526 = vrsqrt.f32 %v1069_v0  ;;  %v1068_v2 = vmul.f32 0.03125, %v1066_v1 }
 0xcbf   :  { %v1070_v3 = vadd.f32 1e-12, %v1068_v2 }
 0xcc1   :  { %2528 = vrsqrt.f32 %v1070_v3 }
 0xcca   :  { %v2527_v4 = vpop.eup %2526 }
 0xccb   :  { %v1073_v5 = vmul.f32 %v2527_v4, %v1057_v13 }
 0xccd   :  { %v1079_v19 = vmul.f32 %v2155_v6, %v1073_v5 }
 0xcce   :  { %v2529_v7 = vpop.eup %2528 }
 0xccf   :  { %v1074_v8 = vmul.f32 %v2529_v7, %v1058_v56  ;;  %v2939_v11 = vadd.f32 %v2156_v9, %v1079_v19 }
 0xcd1   :  { %v1080_v10 = vmul.f32 %v2155_v6, %v1074_v8 }
 0xcd3   :  { %v2941_v14 = vadd.f32 %v2156_v9, %v1080_v10 }
 0xcd5   :  { %v1091_v15 = vpack.c.bf16 %v2941_v14, %v2939_v11 }
 0xcd7   :  { %2356 = vmatmul.mubr.msk.bf16.vlgmr.msra.gmra.mxu0 %vm165_vm7, %v1091_v15 }
 0xcd8   :  { %2361 = vmatprep.mubr.msk.bf16.mxu0 %vm2627_vm8, %v2626_v60 }
 0xd97   :  { %v1146_v17 = vpop.f32.mrf.mxu0 }
 0xd98   :  { %v1147_v18 = vadd.f32 %v2157_v16, %v1146_v17 }
 0xd99   :  { %v2357_v20 = vpop.f32.mrf.mxu0 }
 0xd9a   :  { %v2951_v21 = vpack.c.bf16 %v1147_v18, %v1147_v18 }
 0xd9b   :  { %v1149_v22 = vpop.f32.mrf.mxu0 }
 0xd9c   :  { %v1150_v24 = vadd.f32 %v2157_v16, %v1149_v22  ;;  %1159 = vrot.lane.b32.xlu1 %v2951_v21, %s2628_s23 }
 0xd9d   :  { %v2358_v25 = vpop.f32.mrf.mxu0 }
 0xd9e   :  { %v2955_v26 = vpack.c.bf16 %v1150_v24, %v1150_v24 }
 0xda0   :  { %1207 = vrot.lane.b32.xlu0 %v2955_v26, %s2628_s23 }
 0xe0e   :  { %v1160_v27 = vpop.permute.xlu1 %1159 }
 0xe0f   :  { %v1165_v29 = vsel %vm306_vm9, %v1160_v27, 0 }
 0xe10   :  { %2360 = vmatpush3.bf16.xpose.msra.mxu0 %v1165_v29 }
 0xe11   :  { %2371 = vmatprep.subr.bf16.mxu0 %v2626_v60 }
 0xe12   :  { %v1208_v30 = vpop.permute.xlu0 %1207 }
 0xe13   :  { %v1213_v32 = vsel %vm306_vm9, %v1208_v30, 0 }
 0xe14   :  { %2366 = vmatpush3.bf16.xpose.msra.mxu1 %v1213_v32 }
 0xe15   :  { %2377 = vmatprep.subr.bf16.mxu1 %v2626_v60 }
 0xe17   :  { %2362 = vmatmul.mubr.msk.bf16.vlgmr.msra.gmra.mxu0 %vm306_vm9, %v2951_v21 }
 0xe18   :  { %2373 = vmatprep.mubr.msk.bf16.mxu0 %vm2627_vm8, %v2626_v60 }
 0xe1b   :  { %2368 = vmatmul.mubr.msk.bf16.vlgmr.msra.gmra.mxu1 %vm306_vm9, %v2955_v26 }
 0xe1c   :  { %2379 = vmatprep.mubr.msk.bf16.mxu1 %vm2627_vm8, %v2626_v60 }
 0xed7   :  { %v1201_v33 = vpop.f32.mrf.mxu0 }
 0xed8   :  { %v1255_v34 = vmul.f32 0.25, %v1201_v33 }
 0xed9   :  { %v2363_v35 = vpop.f32.mrf.mxu0 }
 0xeda   :  { %v1257_v36 = vadd.f32 %v1255_v34, %v2818_v42 }
 0xedb   :  { %v1204_v37 = vpop.f32.mrf.mxu0  ;;  %v1249_v31 = vpop.f32.mrf.mxu1 }
 0xedc   :  { %v1256_v38 = vmul.f32 0.25, %v1249_v31  ;;  %v1259_v28 = vsel %vm415_vm10, %v1257_v36, -inf }
 0xedd   :  { %v2369_v39 = vpop.f32.mrf.mxu1  ;;  %1260 = vmax.xlane.f32.xlu1 %v1259_v28  ;;  %v2364_v40 = vpop.f32.mrf.mxu0 }
 0xede   :  { %v1258_v41 = vadd.f32 %v1256_v38, %v2821_v48 }
 0xedf   :  { %v1252_v43 = vpop.f32.mrf.mxu1 }
 0xee0   :  { %v1262_v44 = vsel %vm415_vm10, %v1258_v41, -inf }
 0xee1   :  { %1263 = vmax.xlane.f32.xlu0 %v1262_v44  ;;  %v2370_v45 = vpop.f32.mrf.mxu1 }
 0xeee   :  { %1283 = vrot.lane.b32.xlu1 %v2951_v21, %s2624_s0 }
 0xf66   :  { %v1261_v46 = vpop.xlane.xlu1 %1260 }
 0xf67   :  { %v1265_v47 = vsub.f32 %v1257_v36, %v1261_v46 }
 0xf69   :  { %v1267_v49 = vmul.f32 1.442695, %v1265_v47 }
 0xf6a   :  { %v1264_v12 = vpop.xlane.xlu0 %1263  ;;  %v1284_v50 = vpop.permute.xlu1 %1283 }
 0xf6b   :  { %2530 = vpow2.f32 %v1267_v49  ;;  %v1266_v51 = vsub.f32 %v1258_v41, %v1264_v12  ;;  %v1289_v52 = vsel %vm145_vm3, %v1284_v50, 0 }
 0xf6c   :  { %2372 = vmatpush3.bf16.msra.mxu0 %v1289_v52 }
 0xf6d   :  { %v1269_v13 = vmul.f32 1.442695, %v1266_v51  ;;  %2383 = vmatprep.subr.bf16.mxu0 %v2626_v60 }
 0xf6f   :  { %2532 = vpow2.f32 %v1269_v13 }
 0xf78   :  { %v2531_v53 = vpop.eup %2530 }
 0xf79   :  { %v1271_v54 = vsel %vm415_vm10, %v2531_v53, 0.0 }
 0xf7a   :  { %1272 = vadd.xlane.f32.xlu1 %v1271_v54 }
 0xf7c   :  { %v2533_v55 = vpop.eup %2532 }
 0xf7d   :  { %v1274_v56 = vsel %vm415_vm10, %v2533_v55, 0.0 }
 0xf7e   :  { %1275 = vadd.xlane.f32.xlu0 %v1274_v56  ;;  %v2486_v56 = vld [vmem:[#allocation6 + $0x68] sm:$0xff]  }
 0xf8b   :  { %1381 = vrot.lane.b32.xlu1 %v2951_v21, %s2630_s1 }
 0xf8f   :  { %1431 = vrot.lane.b32.xlu1 %v2955_v26, %s2630_s1 }
 0xf93   :  { %1379 = vrot.lane.b32.xlu1 %v2951_v21, %s2631_s20 }
 0xf94   :  { %1331 = vrot.lane.b32.xlu0 %v2955_v26, %s2624_s0 }
 0xf98   :  { %1429 = vrot.lane.b32.xlu0 %v2955_v26, %s2631_s20 }
0x1003   :  { %v1273_v57 = vpop.xlane.xlu1 %1272 }
0x1004   :  { %2534 = vrcp.f32 %v1273_v57  ;;  %v2487_v57 = vld [vmem:[#allocation6 + $0x60] sm:$0xff]  }
0x1007   :  { %v1276_v58 = vpop.xlane.xlu0 %1275  ;;  %v1382_v63 = vpop.permute.xlu1 %1381 }
0x1008   :  { %2536 = vrcp.f32 %v1276_v58  ;;  %v1387_v2 = vsel %vm306_vm9, %v1382_v63, 0 }
0x100b   :  { %v1332_v59 = vpop.permute.xlu0 %1331  ;;  %v1432_v4 = vpop.permute.xlu1 %1431 }
0x100c   :  { %v1337_v61 = vsel %vm145_vm3, %v1332_v59, 0  ;;  %v1437_v6 = vsel %vm306_vm9, %v1432_v4, 0 }
0x100d   :  { %2378 = vmatpush3.bf16.msra.mxu1 %v1337_v61 }
0x100e   :  { %2389 = vmatprep.subr.bf16.mxu1 %v2626_v60 }
0x100f   :  { %v1380_v7 = vpop.permute.xlu1 %1379  ;;  %v1430_v8 = vpop.permute.xlu0 %1429 }
0x1011   :  { %v2535_v62 = vpop.eup %2534 }
0x1012   :  { %v1278_v23 = vmul.f32 %v2535_v62, %v2531_v53 }
0x1014   :  { %v1281_v0 = vpack.c.bf16 %v1278_v23, %v1278_v23 }
0x1015   :  { %v2537_v1 = vpop.eup %2536 }
0x1016   :  { %2374 = vmatmul.mubr.msk.bf16.vlgmr.msra.gmra.mxu0 %vm415_vm10, %v1281_v0  ;;  %v1280_v3 = vmul.f32 %v2537_v1, %v2533_v55 }
0x1017   :  { %2384 = vmatpush3.bf16.xpose.msra.mxu0 %v1387_v2  ;;  %2385 = vmatprep.mubr.msk.bf16.mxu0 %vm2627_vm8, %v2626_v60 }
0x1018   :  { %v1282_v5 = vpack.c.bf16 %v1280_v3, %v1280_v3  ;;  %2395 = vmatprep.subr.bf16.mxu0 %v2626_v60 }
0x101a   :  { %2380 = vmatmul.mubr.msk.bf16.vlgmr.msra.gmra.mxu1 %vm415_vm10, %v1282_v5 }
0x101b   :  { %2390 = vmatpush3.bf16.xpose.msra.mxu1 %v1437_v6  ;;  %2391 = vmatprep.mubr.msk.bf16.mxu1 %vm2627_vm8, %v2626_v60 }
0x101c   :  { %2401 = vmatprep.subr.bf16.mxu1 %v2626_v60 }
0x101e   :  { %2386 = vmatmul.mubr.msk.bf16.vlgmr.msra.gmra.mxu0 %vm306_vm9, %v1380_v7 }
0x101f   :  { %2397 = vmatprep.mubr.msk.bf16.mxu0 %vm2627_vm8, %v2626_v60 }
0x1022   :  { %2392 = vmatmul.mubr.msk.bf16.vlgmr.msra.gmra.mxu1 %vm306_vm9, %v1430_v8 }
0x1023   :  { %2403 = vmatprep.mubr.msk.bf16.mxu1 %vm2627_vm8, %v2626_v60 }
0x10d6   :  { %v3009_v19 = vpop.f32.mrf.mxu0 }
0x10d8   :  { %v2375_v9 = vpop.f32.mrf.mxu0 }
0x10d9   :  { %v2171_v9 = vld [vmem:[%s3106_s4 + $0x13] ss:$0 sm:$0xff] }
0x10da   :  { %v1328_v10 = vpop.f32.mrf.mxu0  ;;  %v3011_v15 = vpop.f32.mrf.mxu1 }
0x10dc   :  { %v2376_v16 = vpop.f32.mrf.mxu0  ;;  %v2381_v17 = vpop.f32.mrf.mxu1 }
0x10de   :  { %v1376_v18 = vpop.f32.mrf.mxu1  ;;  %v1423_v20 = vpop.f32.mrf.mxu0 }
0x10df   :  { %v1479_v22 = vmul.f32 0.25, %v1423_v20 }
0x10e0   :  { %v2382_v24 = vpop.f32.mrf.mxu1  ;;  %v2387_v25 = vpop.f32.mrf.mxu0 }
0x10e1   :  { %v1481_v27 = vadd.f32 %v1479_v22, %v2818_v42 }
0x10e2   :  { %v1426_v29 = vpop.f32.mrf.mxu0  ;;  %v1473_v30 = vpop.f32.mrf.mxu1 }
0x10e3   :  { %v1480_v32 = vmul.f32 0.25, %v1473_v30  ;;  %v1483_v33 = vsel %vm415_vm10, %v1481_v27, -inf }
0x10e4   :  { %v2393_v34 = vpop.f32.mrf.mxu1  ;;  %1484 = vmax.xlane.f32.xlu1 %v1483_v33  ;;  %v2388_v35 = vpop.f32.mrf.mxu0 }
0x10e5   :  { %v1482_v36 = vadd.f32 %v1480_v32, %v2821_v48 }
0x10e6   :  { %v1476_v37 = vpop.f32.mrf.mxu1 }
0x10e7   :  { %v1486_v31 = vsel %vm415_vm10, %v1482_v36, -inf }
0x10e8   :  { %1487 = vmax.xlane.f32.xlu0 %v1486_v31  ;;  %v2394_v38 = vpop.f32.mrf.mxu1  ;;  %v2488_v31 = vld [vmem:[#allocation6 + $0x78] sm:$0xff]  }
0x10f5   :  { %1507 = vrot.lane.b32.xlu1 %v2951_v21, %s2632_s27 }
0x116d   :  { %v1485_v28 = vpop.xlane.xlu1 %1484 }
0x116e   :  { %v1489_v42 = vsub.f32 %v1481_v27, %v1485_v28 }
0x1170   :  { %v1491_v39 = vmul.f32 1.442695, %v1489_v42 }
0x1171   :  { %v1488_v40 = vpop.xlane.xlu0 %1487  ;;  %v1508_v41 = vpop.permute.xlu1 %1507 }
0x1172   :  { %2538 = vpow2.f32 %v1491_v39  ;;  %v1490_v43 = vsub.f32 %v1482_v36, %v1488_v40  ;;  %v1513_v44 = vsel %vm145_vm3, %v1508_v41, 0 }
0x1173   :  { %2396 = vmatpush3.bf16.msra.mxu0 %v1513_v44 }
0x1174   :  { %v1493_v45 = vmul.f32 1.442695, %v1490_v43  ;;  %2407 = vmatprep.subr.bf16.mxu0 %v2626_v60 }
0x1176   :  { %2540 = vpow2.f32 %v1493_v45  ;;  %v2175_v45 = vld [vmem:[%s3106_s4 + $0x14] ss:$0 sm:$0xff] }
0x117f   :  { %v2539_v48 = vpop.eup %2538 }
0x1180   :  { %v1495_v46 = vsel %vm415_vm10, %v2539_v48, 0.0 }
0x1181   :  { %1496 = vadd.xlane.f32.xlu0 %v1495_v46 }
0x1183   :  { %v2541_v47 = vpop.eup %2540 }
0x1184   :  { %v1498_v21 = vsel %vm415_vm10, %v2541_v47, 0.0 }
0x1185   :  { %1499 = vadd.xlane.f32.xlu0 %v1498_v21  ;;  %v2176_v21 = vld [vmem:[%s3106_s4 + $0x15] ss:$0 sm:$0xff] }
0x119b   :  { %1555 = vrot.lane.b32.xlu0 %v2955_v26, %s2632_s27 }
0x120a   :  { %v1497_v49 = vpop.xlane.xlu0 %1496 }
0x120b   :  { %2542 = vrcp.f32 %v1497_v49 }
0x120e   :  { %v1500_v12 = vpop.xlane.xlu0 %1499 }
0x120f   :  { %2544 = vrcp.f32 %v1500_v12 }
0x1212   :  { %v1556_v50 = vpop.permute.xlu0 %1555 }
0x1213   :  { %v1561_v51 = vsel %vm145_vm3, %v1556_v50, 0 }
0x1214   :  { %2402 = vmatpush3.bf16.msra.mxu1 %v1561_v51 }
0x1215   :  { %2415 = vmatprep.subr.bf16.mxu1 %v2626_v60 }
0x1218   :  { %v2543_v52 = vpop.eup %2542 }
0x1219   :  { %v1502_v13 = vmul.f32 %v2543_v52, %v2539_v48  ;;  %v2490_v52 = vld [vmem:[#allocation6 + $0x98] sm:$0xff]  }
0x121b   :  { %v1505_v53 = vpack.c.bf16 %v1502_v13, %v1502_v13  ;;  %v2491_v13 = vld [vmem:[#allocation6 + $0x90] sm:$0xff]  }
0x121c   :  { %v2545_v54 = vpop.eup %2544 }
0x121d   :  { %2398 = vmatmul.mubr.msk.bf16.vlgmr.msra.gmra.mxu0 %vm415_vm10, %v1505_v53  ;;  %v1504_v55 = vmul.f32 %v2545_v54, %v2541_v47  ;;  %v2492_v53 = vld [vmem:[#allocation6 + $0x88] sm:$0xff]   ;;  %v2493_v54 = vld [vmem:[#allocation6 + $0x80] sm:$0xff]  }
0x121e   :  { %2411 = vmatprep.mubr.msk.bf16.mxu0 %vm2627_vm8, %v2626_v60  ;;  %2408 = vmatpush3.bf16.msra.mxu0 %v2486_v56 }
0x121f   :  { %v1506_v26 = vpack.c.bf16 %v1504_v55, %v1504_v55  ;;  %2409 = vmatprep.subr.bf16.mxu0 %v2626_v60  ;;  %v2177_v55 = vld [vmem:[%s3106_s4 + $0x16] ss:$0 sm:$0xff] }
0x1221   :  { %2404 = vmatmul.mubr.msk.bf16.vlgmr.msra.gmra.mxu1 %vm415_vm10, %v1506_v26 }
0x1222   :  { %2419 = vmatprep.mubr.msk.bf16.mxu1 %vm2627_vm8, %v2626_v60  ;;  %2410 = vmatpush3.bf16.msra.mxu0 %v2487_v57 }
0x1223   :  { %2423 = vmatprep.subr.bf16.mxu0 %v2626_v60  ;;  %2416 = vmatpush3.bf16.msra.mxu1 %v2488_v31 }
0x1224   :  { %2417 = vmatprep.subr.bf16.mxu1 %v2626_v60 }
0x12dd   :  { %v1549_v58 = vpop.f32.mrf.mxu0 }
0x12df   :  { %v2399_v59 = vpop.f32.mrf.mxu0 }
0x12e1   :  { %v1552_v61 = vpop.f32.mrf.mxu0  ;;  %v1597_v62 = vpop.f32.mrf.mxu1 }
0x12e2   :  { %v2469_v63 = vpack.i.bf16 %v1597_v62, %v1549_v58 }
0x12e3   :  { %v2400_v23 = vpop.f32.mrf.mxu0  ;;  %v2405_v0 = vpop.f32.mrf.mxu1 }
0x12e4   :  { %2470 = vrot.lane.b32.xlu1 %v2469_v63, %s2633_s29 }
0x12e5   :  { %v1600_v1 = vpop.f32.mrf.mxu1 }
0x12e7   :  { %v2406_v2 = vpop.f32.mrf.mxu1 }
0x1356   :  { %v2471_v3 = vpop.permute.xlu1 %2470 }
0x1357   :  { %v2473_v4 = vunpack.i.h.bf16 %v2471_v3  ;;  %v2472_v5 = vunpack.i.l.bf16 %v2471_v3 }
0x1359   :  { %v1612_v6 = vsel %vm306_vm9, %v3011_v15, %v2473_v4  ;;  %v1611_v7 = vsel %vm306_vm9, %v3009_v19, %v2472_v5 }
0x135a   :  { %v1617_v8 = vpack.c.bf16 %v1612_v6, %v1611_v7 }
0x135c   :  { %2412 = vmatmul.mubr.msk.bf16.vlgmr.msra.gmra.mxu0 %vm165_vm7, %v1617_v8 }
0x135d   :  { %2431 = vmatprep.mubr.msk.bf16.mxu0 %vm2627_vm8, %v2626_v60  ;;  %2424 = vmatpush3.bf16.msra.mxu0 %v2490_v52 }
0x135e   :  { %2425 = vmatprep.subr.bf16.mxu0 %v2626_v60 }
0x1361   :  { %2426 = vmatpush3.bf16.msra.mxu0 %v2491_v13 }
0x1362   :  { %2427 = vmatprep.subr.bf16.mxu0 %v2626_v60 }
0x1365   :  { %2428 = vmatpush3.bf16.msra.mxu0 %v2492_v53 }
0x1366   :  { %2429 = vmatprep.subr.bf16.mxu0 %v2626_v60 }
0x1369   :  { %2430 = vmatpush3.bf16.msra.mxu0 %v2493_v54  ;;  %v2188_v54 = vld [vmem:[%s3106_s4 + $0x19] ss:$0 sm:$0xff] }
0x141c   :  { %v1672_v10 = vpop.f32.mrf.mxu0 }
0x141d   :  { %v1673_v16 = vadd.f32 %v2171_v9, %v1672_v10 }
0x141e   :  { %v2413_v17 = vpop.f32.mrf.mxu0 }
0x141f   :  { %v1679_v18 = vadd.f32 %v1673_v16, %v2939_v11 }
0x1420   :  { %v1675_v20 = vpop.f32.mrf.mxu0 }
0x1421   :  { %v1676_v15 = vadd.f32 %v2171_v9, %v1675_v20  ;;  %v1683_v22 = vsel %vm165_vm7, %v1679_v18, 0.0 }
0x1422   :  { %1684 = vadd.xlane.f32.xlu1 %v1683_v22  ;;  %v2414_v19 = vpop.f32.mrf.mxu0  ;;  %v2181_v22 = vld [vmem:[%s3106_s4 + $0x17] ss:$0 sm:$0xff] }
0x1423   :  { %v1680_v24 = vadd.f32 %v1676_v15, %v2941_v14  ;;  %v2489_v14 = vld [vmem:[#allocation6 + $0x70] sm:$0xff]  }
0x1424   :  { %2418 = vmatpush3.bf16.msra.mxu1 %v2489_v14 }
0x1425   :  { %v1686_v25 = vsel %vm165_vm7, %v1680_v24, 0.0  ;;  %2435 = vmatprep.subr.bf16.mxu1 %v2626_v60 }
0x1426   :  { %1687 = vadd.xlane.f32.xlu0 %v1686_v25 }
0x14ab   :  { %v1685_v27 = vpop.xlane.xlu1 %1684 }
0x14ac   :  { %v1689_v29 = vmul.f32 0.03125, %v1685_v27 }
0x14ae   :  { %v1691_v30 = vsub.f32 %v1679_v18, %v1689_v29 }
0x14af   :  { %v1688_v32 = vpop.xlane.xlu0 %1687 }
0x14b0   :  { %v1690_v33 = vmul.f32 0.03125, %v1688_v32  ;;  %v1693_v34 = vmul.f32 %v1691_v30, %v1691_v30 }
0x14b2   :  { %v1692_v35 = vsub.f32 %v1680_v24, %v1690_v33  ;;  %v1695_v11 = vsel %vm165_vm7, %v1693_v34, 0.0 }
0x14b3   :  { %1696 = vadd.xlane.f32.xlu0 %v1695_v11 }
0x14b4   :  { %v1694_v36 = vmul.f32 %v1692_v35, %v1692_v35 }
0x14b6   :  { %v1698_v37 = vsel %vm165_vm7, %v1694_v36, 0.0 }
0x14b7   :  { %1699 = vadd.xlane.f32.xlu1 %v1698_v37 }
0x153c   :  { %v1697_v38 = vpop.xlane.xlu0 %1696 }
0x153d   :  { %v1701_v28 = vmul.f32 0.03125, %v1697_v38 }
0x153f   :  { %v1703_v42 = vadd.f32 1e-12, %v1701_v28 }
0x1540   :  { %v1700_v39 = vpop.xlane.xlu1 %1699 }
0x1541   :  { %2546 = vrsqrt.f32 %v1703_v42  ;;  %v1702_v40 = vmul.f32 0.03125, %v1700_v39 }
0x1543   :  { %v1704_v41 = vadd.f32 1e-12, %v1702_v40 }
0x1545   :  { %2548 = vrsqrt.f32 %v1704_v41  ;;  %v2494_v41 = vld [vmem:[#allocation6 + $0xa8] sm:$0xff]  }
0x154e   :  { %v2547_v43 = vpop.eup %2546 }
0x154f   :  { %v1707_v44 = vmul.f32 %v2547_v43, %v1691_v30  ;;  %v2495_v43 = vld [vmem:[#allocation6 + $0xa0] sm:$0xff]  }
0x1551   :  { %v1713_v47 = vmul.f32 %v2175_v45, %v1707_v44 }
0x1552   :  { %v2549_v48 = vpop.eup %2548 }
0x1553   :  { %v1708_v46 = vmul.f32 %v2549_v48, %v1692_v35  ;;  %v1719_v12 = vadd.f32 %v2176_v21, %v1713_v47 }
0x1555   :  { %v1714_v49 = vmul.f32 %v2175_v45, %v1708_v46 }
0x1557   :  { %v1720_v50 = vadd.f32 %v2176_v21, %v1714_v49 }
0x1559   :  { %v1733_v51 = vpack.c.bf16 %v1720_v50, %v1719_v12 }
0x155b   :  { %2420 = vmatmul.mubr.msk.bf16.vlgmr.msra.gmra.mxu1 %vm165_vm7, %v1733_v51  ;;  %v2187_v51 = vld [vmem:[%s3106_s4 + $0x18] ss:$0 sm:$0xff] }
0x155c   :  { %2439 = vmatprep.mubr.msk.bf16.mxu1 %vm2627_vm8, %v2626_v60  ;;  %2436 = vmatpush3.bf16.msra.mxu1 %v2494_v41 }
0x155d   :  { %2437 = vmatprep.subr.bf16.mxu1 %v2626_v60 }
0x1560   :  { %2438 = vmatpush3.bf16.msra.mxu1 %v2495_v43 }
0x1561   :  { %2443 = vmatprep.subr.bf16.mxu1 %v2626_v60 }
0x161b   :  { %v1788_v26 = vpop.f32.mrf.mxu1 }
0x161c   :  { %v1789_v56 = vadd.f32 %v2177_v55, %v1788_v26 }
0x161d   :  { %v2421_v57 = vpop.f32.mrf.mxu1 }
0x161e   :  { %v1797_v58 = vmul.f32 0.044715, %v1789_v56  ;;  %v1795_v10 = vmul.f32 0.5, %v1789_v56 }
0x161f   :  { %v1791_v59 = vpop.f32.mrf.mxu1 }
0x1620   :  { %v1799_v61 = vmul.f32 %v1797_v58, %v1789_v56  ;;  %v1792_v62 = vadd.f32 %v2177_v55, %v1791_v59  ;;  %v2496_v59 = vld [vmem:[#allocation6 + $0xb8] sm:$0xff]  }
0x1621   :  { %v2422_v63 = vpop.f32.mrf.mxu1 }
0x1622   :  { %v1801_v23 = vmul.f32 %v1799_v61, %v1789_v56  ;;  %v1798_v0 = vmul.f32 0.044715, %v1792_v62  ;;  %v1796_v16 = vmul.f32 0.5, %v1792_v62  ;;  %v2497_v61 = vld [vmem:[#allocation6 + $0xb0] sm:$0xff]  }
0x1624   :  { %v1803_v1 = vadd.f32 %v1801_v23, %v1789_v56  ;;  %v1800_v2 = vmul.f32 %v1798_v0, %v1792_v62 }
0x1626   :  { %v1805_v3 = vmul.f32 0.7978846, %v1803_v1  ;;  %v1802_v4 = vmul.f32 %v1800_v2, %v1792_v62 }
0x1628   :  { %2550 = vtanh.f32 %v1805_v3  ;;  %v1804_v5 = vadd.f32 %v1802_v4, %v1792_v62  ;;  %v2189_v62 = vld [vmem:[%s3106_s4 + $0x1a] ss:$0 sm:$0xff] }
0x162a   :  { %v1806_v6 = vmul.f32 0.7978846, %v1804_v5 }
0x162c   :  { %2552 = vtanh.f32 %v1806_v6 }
0x1635   :  { %v2551_v7 = vpop.eup %2550 }
0x1636   :  { %v1809_v8 = vadd.f32 1.0, %v2551_v7 }
0x1638   :  { %v1811_v18 = vmul.f32 %v1809_v8, %v1795_v10 }
0x1639   :  { %v2553_v9 = vpop.eup %2552 }
0x163a   :  { %v1810_v17 = vadd.f32 1.0, %v2553_v9 }
0x163c   :  { %v1812_v20 = vmul.f32 %v1810_v17, %v1796_v16 }
0x163e   :  { %v1813_v15 = vpack.c.bf16 %v1812_v20, %v1811_v18 }
0x1640   :  { %2432 = vmatmul.mubr.msk.bf16.vlgmr.msra.gmra.mxu0 %vm1000_vm11, %v1813_v15 }
0x1700   :  { %v1880_v19 = vpop.f32.mrf.mxu0 }
0x1701   :  { %v1881_v24 = vadd.f32 %v2181_v22, %v1880_v19 }
0x1702   :  { %v2433_v25 = vpop.f32.mrf.mxu0 }
0x1703   :  { %v1887_v27 = vadd.f32 %v1881_v24, %v1719_v12 }
0x1704   :  { %v1883_v29 = vpop.f32.mrf.mxu0 }
0x1705   :  { %v1884_v30 = vadd.f32 %v2181_v22, %v1883_v29  ;;  %v1891_v32 = vsel %vm165_vm7, %v1887_v27, 0.0 }
0x1706   :  { %1892 = vadd.xlane.f32.xlu1 %v1891_v32  ;;  %v2434_v33 = vpop.f32.mrf.mxu0 }
0x1707   :  { %v1888_v34 = vadd.f32 %v1884_v30, %v1720_v50 }
0x1709   :  { %v1894_v35 = vsel %vm165_vm7, %v1888_v34, 0.0 }
0x170a   :  { %1895 = vadd.xlane.f32.xlu0 %v1894_v35 }
0x178f   :  { %v1893_v11 = vpop.xlane.xlu1 %1892 }
0x1790   :  { %v1897_v36 = vmul.f32 0.03125, %v1893_v11 }
0x1792   :  { %v1899_v37 = vsub.f32 %v1887_v27, %v1897_v36 }
0x1793   :  { %v1896_v31 = vpop.xlane.xlu0 %1895 }
0x1794   :  { %v1898_v14 = vmul.f32 0.03125, %v1896_v31  ;;  %v1901_v38 = vmul.f32 %v1899_v37, %v1899_v37 }
0x1796   :  { %v1900_v28 = vsub.f32 %v1888_v34, %v1898_v14  ;;  %v1903_v42 = vsel %vm165_vm7, %v1901_v38, 0.0 }
0x1797   :  { %1904 = vadd.xlane.f32.xlu1 %v1903_v42 }
0x1798   :  { %v1902_v39 = vmul.f32 %v1900_v28, %v1900_v28 }
0x179a   :  { %v1906_v40 = vsel %vm165_vm7, %v1902_v39, 0.0 }
0x179b   :  { %1907 = vadd.xlane.f32.xlu0 %v1906_v40 }
0x1820   :  { %v1905_v44 = vpop.xlane.xlu1 %1904 }
0x1821   :  { %v1909_v45 = vmul.f32 0.03125, %v1905_v44 }
0x1823   :  { %v1911_v48 = vadd.f32 1e-12, %v1909_v45 }
0x1824   :  { %v1908_v46 = vpop.xlane.xlu0 %1907 }
0x1825   :  { %2554 = vrsqrt.f32 %v1911_v48  ;;  %v1910_v47 = vmul.f32 0.03125, %v1908_v46 }
0x1827   :  { %v1912_v21 = vadd.f32 1e-12, %v1910_v47 }
0x1829   :  { %2556 = vrsqrt.f32 %v1912_v21 }
0x1832   :  { %v2555_v49 = vpop.eup %2554 }
0x1833   :  { %v1915_v12 = vmul.f32 %v2555_v49, %v1899_v37 }
0x1835   :  { %v1921_v13 = vmul.f32 %v2187_v51, %v1915_v12 }
0x1836   :  { %v2557_v50 = vpop.eup %2556 }
0x1837   :  { %v1916_v52 = vmul.f32 %v2557_v50, %v1900_v28  ;;  %v1927_v26 = vadd.f32 %v2188_v54, %v1921_v13 }
0x1839   :  { %v1922_v53 = vmul.f32 %v2187_v51, %v1916_v52 }
0x183b   :  { %v1928_v55 = vadd.f32 %v2188_v54, %v1922_v53 }
0x183d   :  { %v1930_v56 = vrot.slane %v1928_v55, 7 }
0x183f   :  { %v1932_v57 = vsel %vm139_vm0, %v1927_v26, %v1930_v56 }
0x1840   :  { %v1937_v58 = vpack.c.bf16 %v1932_v57, %v1932_v57 }
0x1842   :  { %2440 = vmatmul.mubr.msk.bf16.vlgmr.msra.gmra.mxu1 %vm165_vm7, %v1937_v58 }
0x1843   :  { %2447 = vmatprep.mubr.msk.bf16.mxu1 %vm2627_vm8, %v2626_v60  ;;  %2444 = vmatpush3.bf16.msra.mxu1 %v2496_v59 }
0x1844   :  { %2445 = vmatprep.subr.bf16.mxu1 %v2626_v60  ;;  %v2193_v60 = vld [vmem:[%s3106_s4 + $0x1b] ss:$0 sm:$0xff]  ;;  %s2082_s4 = sshll.u32 %s2634_s8, 4  ;;  %s2083_s4 = int_to_ptr.vmem [resolvable:$true] %s2082_s4 }
0x1845   :  { %s2596_s9 = scalar_lea.vmem %s2083_s4, 32  ;;  %p2601_p11 = scmp.lt.s32.totalorder %s2083_s4, %s2083_s4 }
0x1846   :  { %p2597_p10 = scmp.ne.s32.totalorder %s2083_s4, %s2596_s9  ;;  %p2602_p12 = scmp.lt.s32.totalorder %s2596_s9, %s2596_s9 }
0x1847   :  { %2446 = vmatpush3.bf16.msra.mxu1 %v2497_v61 }
0x1848   :  { %p2603_p13 = por %p2602_p12, %p2601_p11 }
0x184a   :  { %p2604_p0 = pnand %p2603_p13, %p2597_p10 }
0x1902   :  { %v1992_v63 = vpop.f32.mrf.mxu1 }
0x1903   :  { %v1993_v23 = vadd.f32 %v2189_v62, %v1992_v63 }
0x1904   :  { %v2441_v0 = vpop.f32.mrf.mxu1 }
0x1905   :  { %2558 = vtanh.f32 %v1993_v23 }
0x1906   :  { %v1995_v1 = vpop.f32.mrf.mxu1 }
0x1908   :  { %v2442_v2 = vpop.f32.mrf.mxu1 }
0x1912   :  { %v2559_v3 = vpop.eup %2558 }
0x1913   :  { %v2003_v4 = vpack.c.bf16 %v2559_v3, %v2559_v3 }
0x1915   :  { %2448 = vmatmul.mubr.msk.bf16.vlgmr.msra.gmra.mxu1 %vm165_vm7, %v2003_v4 }
0x19d5   :  { %v2058_v5 = vpop.f32.mrf.mxu1 }
0x19d6   :  { %v2059_v6 = vadd.f32 %v2193_v60, %v2058_v5 }
0x19d7   :  { %v2449_v7 = vpop.f32.mrf.mxu1 }
0x19d8   :  { %v2064_v8 = vsel %vm141_vm1, %v2059_v6, -inf }
0x19d9   :  { %2065 = vmax.xlane.f32.xlu0 %v2064_v8  ;;  %v2061_v9 = vpop.f32.mrf.mxu1 }
0x19db   :  { %v2450_v10 = vpop.f32.mrf.mxu1 }
0x1a62   :  { %v2066_v16 = vpop.xlane.xlu0 %2065 }
0x1a63   :  { %v2067_v17 = vsub.f32 %v2059_v6, %v2066_v16 }
0x1a65   :  { %v2068_v18 = vmul.f32 1.442695, %v2067_v17 }
0x1a67   :  { %2560 = vpow2.f32 %v2068_v18 }
0x1a74   :  { %v2561_v20 = vpop.eup %2560 }
0x1a75   :  { %v2070_v15 = vsel %vm141_vm1, %v2561_v20, 0.0 }
0x1a76   :  { %2071 = vadd.xlane.f32.xlu1 %v2070_v15 }
0x1aff   :  { %v2072_v22 = vpop.xlane.xlu1 %2071 }
0x1b00   :  { %2562 = vrcp.f32 %v2072_v22 }
0x1b0d   :  { %v2563_v19 = vpop.eup %2562 }
0x1b0e   :  { %v2074_v24 = vmul.f32 %v2563_v19, %v2561_v20 }
0x1b10   :  { %2075 = vst [vmem:[#allocation7] sm:$0x3] %v2074_v24 }
0x1b11   :  { %2607 = shalt.err (!%p2604_p0)
}
0x1b12   :  { %2085 = dma.vmem_to_hbm [thread:$0]  %s2083_s4, 32, %s3107_s5, [#allocation4]  }
0x1b13   :  { %2620 = dma.done.wait [#allocation4], 32  }
0x1b14   :  { %2621 = vsyncadd [#allocation4], 4294967264 }
0x1b15   :  { %2089 = vsyncpa [#allocation3], 1 }
0x1b16   :  { %2090 = vsyncpa [#allocation4], 1 }
0x1b17   :  { %2091 = vsyncpa [#allocation5], 1 }

</bundles_post_ra>
